<compile_context>
chip_gen: v5e
topology: v5e:2x2
jax: 0.10.0
libtpu: 0.0.40
codegen_flags: <defaults>
</compile_context>

<pallas_src>
import numpy as np
import jax
import jax.numpy as jnp
from jax import lax
from jax.experimental import pallas as pl
from jax.experimental.pallas import tpu as pltpu

# ----------------------------- sizes -----------------------------------
VOCAB = 128     # vocab_size
EMBED = 32      # embedding_dim
HIDDEN = 32     # hidden_dim
CTX = 4         # number of context words (matches the hard-coded "/ 4")
NUM_NEG = 20    # negatives drawn in __random__
LANE = 128


def _round_up(x, m):
    return (x + m - 1) // m * m


# ----------------------------- kernel ----------------------------------
def cbow_kernel(idx_ref,            # (TILE_B, CTX) int32 context word ids
                emb_ref,            # (V, E_pad)   f32 embedding table (zero-padded cols)
                w1_ref, b1_ref,     # (E_pad, H_pad), (1, H_pad)
                w2_ref, b2_ref,     # (H_pad, V), (1, V)
                bias_ref,           # (TILE_B, V) additive mask: 0.0 keep / -inf masked
                out_ref):           # (TILE_B, V) f32 softmax output
    tb, ctx = idx_ref.shape
    v = emb_ref.shape[0]

    # Embedding lookup + sum over context / 4, as a counts @ table MXU matmul.
    idx = idx_ref[...]                                            # (tb, ctx)
    vocab_iota = lax.broadcasted_iota(jnp.int32, (tb, v), 1)      # (tb, v)
    counts = jnp.zeros((tb, v), dtype=jnp.float32)
    for i in range(ctx):                                          # static unrolled (ctx == 4)
        counts = counts + (idx[:, i:i + 1] == vocab_iota).astype(jnp.float32)
    counts = counts * 0.25                                        # the "/ 4"
    embed = jnp.dot(counts, emb_ref[...],
                    preferred_element_type=jnp.float32)           # (tb, E_pad)

    # layer1 + ReLU (lane-dense, padded to 128)
    h = jnp.dot(embed, w1_ref[...],
                preferred_element_type=jnp.float32) + b1_ref[...]
    h = jnp.maximum(h, 0.0)                                       # (tb, H_pad)

    # layer2
    logits = jnp.dot(h, w2_ref[...],
                     preferred_element_type=jnp.float32) + b2_ref[...]  # (tb, V)

    # additive mask (-inf for masked positions) + softmax over the vocab axis
    masked = logits + bias_ref[...]
    m = jnp.max(masked, axis=-1, keepdims=True)
    e = jnp.exp(masked - m)                                       # masked -> exp(-inf)=0
    denom = jnp.sum(e, axis=-1, keepdims=True)
    out_ref[...] = e * pl.reciprocal(denom, approx=True)


# ----------------------------- wrapper ----------------------------------
def cbow_forward(idx, emb, w1, b1, w2, b2, mask_bias, *, tile_b=128):
    B, ctx = idx.shape
    V, E = emb.shape
    H = w1.shape[1]
    assert V % LANE == 0, "vocab must be a multiple of 128 for lane-dense output"
    assert B % tile_b == 0 and tile_b % 8 == 0

    # Zero-pad embedding/hidden dims to 128 so intermediates are lane-dense.
    E_p = _round_up(E, LANE)
    H_p = _round_up(H, LANE)

    def pad2(x, rows, cols):
        return jnp.pad(x, ((0, rows - x.shape[0]), (0, cols - x.shape[1])))

    emb_p = pad2(emb, V, E_p)        # (V, E_p)
    w1_p = pad2(w1, E_p, H_p)        # (E_p, H_p)
    b1_p = pad2(b1, 1, H_p)          # (1, H_p)
    w2_p = pad2(w2, H_p, V)          # (H_p, V)

    grid = (B // tile_b,)
    return pl.pallas_call(
        cbow_kernel,
        out_shape=jax.ShapeDtypeStruct((B, V), jnp.float32),
        grid=grid,
        in_specs=[
            pl.BlockSpec((tile_b, ctx), lambda i: (i, 0)),      # per-tile indices
            # constant index_maps -> weights stay VMEM-resident across grid steps
            pl.BlockSpec((V, E_p), lambda i: (0, 0)),
            pl.BlockSpec((E_p, H_p), lambda i: (0, 0)),
            pl.BlockSpec((1, H_p), lambda i: (0, 0)),
            pl.BlockSpec((H_p, V), lambda i: (0, 0)),
            pl.BlockSpec((1, V), lambda i: (0, 0)),
            pl.BlockSpec((tile_b, V), lambda i: (i, 0)),        # per-tile mask bias
        ],
        out_specs=pl.BlockSpec((tile_b, V), lambda i: (i, 0)),
        compiler_params=pltpu.CompilerParams(
            dimension_semantics=("parallel",)),
    )(idx, emb_p, w1_p, b1_p, w2_p, b2, mask_bias)


def build_negative_mask_bias(targets, vocab_size, num_random=NUM_NEG, seed=0):
    """Host-side re-implementation of CBOW.__random__ + the mask loop.

    Returns an additive bias: 0.0 at kept (sampled) positions, -inf elsewhere.
    """
    rng = np.random.RandomState(seed)
    bias = np.full((len(targets), vocab_size), -np.inf, dtype=np.float32)
    for b, target in enumerate(targets):
        rand_list = rng.randint(vocab_size, size=num_random)
        if target in rand_list:
            while True:
                temp = rng.randint(vocab_size, size=1)
                if temp[0] != target:
                    rand_list = np.append(rand_list, temp)
                    break
        else:
            rand_list = np.append(rand_list, target)
        bias[b, rand_list] = 0.0
    return jnp.asarray(bias)


# ----------------------------- main -------------------------------------
if __name__ == "__main__":
    B = 256                      # batch of CBOW examples per call
    key = jax.random.PRNGKey(0)
    k_emb, k_w1, k_b1, k_w2, k_b2, k_idx, k_tgt = jax.random.split(key, 7)

    # Deterministic synthetic parameters (shapes from the module __init__).
    emb = jax.random.normal(k_emb, (VOCAB, EMBED), dtype=jnp.float32) * 0.1
    w1 = jax.random.normal(k_w1, (EMBED, HIDDEN), dtype=jnp.float32) * 0.1
    b1 = jax.random.normal(k_b1, (1, HIDDEN), dtype=jnp.float32) * 0.1
    w2 = jax.random.normal(k_w2, (HIDDEN, VOCAB), dtype=jnp.float32) * 0.1
    b2 = jax.random.normal(k_b2, (1, VOCAB), dtype=jnp.float32) * 0.1

    # Example forward inputs: B examples of 4 context word ids + a target id.
    idx = jax.random.randint(k_idx, (B, CTX), 0, VOCAB, dtype=jnp.int32)
    targets = np.asarray(jax.random.randint(k_tgt, (B,), 0, VOCAB, dtype=jnp.int32))
    mask_bias = build_negative_mask_bias(targets, VOCAB)

    out = cbow_forward(idx, emb, w1, b1, w2, b2, mask_bias)
    out = jax.block_until_ready(out)

    # Pure-JAX reference check (same math on unpadded weights, exact divide).
    embed_ref = jnp.sum(emb[idx], axis=1) / 4.0                 # (B, E)
    h_ref = jnp.maximum(embed_ref @ w1 + b1, 0.0)               # (B, H)
    logits_ref = h_ref @ w2 + b2                                # (B, V)
    ref = jax.nn.softmax(logits_ref + mask_bias, axis=-1)       # (B, V)

    np.testing.assert_allclose(np.asarray(out), np.asarray(ref),
                               rtol=1e-2, atol=1e-5)

    print("KERNEL_OK")
</pallas_src>

<mosaic_0001>
module attributes {stable_mosaic.version = 11 : i64} {
  func.func @cbow_kernel(%arg0: i32, %arg1: memref<128x4xi32, #tpu.memory_space<vmem>>, %arg2: memref<128x128xf32, #tpu.memory_space<vmem>>, %arg3: memref<128x128xf32, #tpu.memory_space<vmem>>, %arg4: memref<1x128xf32, #tpu.memory_space<vmem>>, %arg5: memref<128x128xf32, #tpu.memory_space<vmem>>, %arg6: memref<1x128xf32, #tpu.memory_space<vmem>>, %arg7: memref<128x128xf32, #tpu.memory_space<vmem>>, %arg8: memref<128x128xf32, #tpu.memory_space<vmem>>) attributes {dimension_semantics = [#tpu.dimension_semantics<parallel>], iteration_bounds = array<i64: 2>, scalar_prefetch = 0 : i64, scratch_operands = 0 : i64, tpu.core_type = #tpu.core_type<tc>, window_params = [{transform_indices = @transform_0, window_bounds = array<i64: 128, 4>}, {pipeline_mode = #tpu.pipeline_mode<synchronous>, transform_indices = @transform_1, window_bounds = array<i64: 128, 128>}, {pipeline_mode = #tpu.pipeline_mode<synchronous>, transform_indices = @transform_2, window_bounds = array<i64: 128, 128>}, {pipeline_mode = #tpu.pipeline_mode<synchronous>, transform_indices = @transform_3, window_bounds = array<i64: 1, 128>}, {pipeline_mode = #tpu.pipeline_mode<synchronous>, transform_indices = @transform_4, window_bounds = array<i64: 128, 128>}, {pipeline_mode = #tpu.pipeline_mode<synchronous>, transform_indices = @transform_5, window_bounds = array<i64: 1, 128>}, {transform_indices = @transform_6, window_bounds = array<i64: 128, 128>}, {transform_indices = @transform_7, window_bounds = array<i64: 128, 128>}]} {
    %c0 = arith.constant 0 : index
    %c0_0 = arith.constant 0 : index
    %0 = vector.load %arg1[%c0, %c0_0] : memref<128x4xi32, #tpu.memory_space<vmem>>, vector<128x4xi32>
    %1 = tpu.iota {dimensions = array<i32: 1>} : vector<128x128xi32>
    %cst = arith.constant 0.000000e+00 : f32
    %2 = vector.broadcast %cst : f32 to vector<128x128xf32>
    %3 = vector.extract_strided_slice %0 {offsets = [0, 0], sizes = [128, 1], strides = [1, 1]} : vector<128x4xi32> to vector<128x1xi32>
    %4 = vector.broadcast %3 : vector<128x1xi32> to vector<128x128xi32>
    %5 = arith.cmpi eq, %4, %1 : vector<128x128xi32>
    %6 = arith.extui %5 : vector<128x128xi1> to vector<128x128xi32>
    %7 = arith.sitofp %6 : vector<128x128xi32> to vector<128x128xf32>
    %8 = arith.addf %2, %7 : vector<128x128xf32>
    %9 = vector.extract_strided_slice %0 {offsets = [0, 1], sizes = [128, 1], strides = [1, 1]} : vector<128x4xi32> to vector<128x1xi32>
    %10 = vector.broadcast %9 : vector<128x1xi32> to vector<128x128xi32>
    %11 = arith.cmpi eq, %10, %1 : vector<128x128xi32>
    %12 = arith.extui %11 : vector<128x128xi1> to vector<128x128xi32>
    %13 = arith.sitofp %12 : vector<128x128xi32> to vector<128x128xf32>
    %14 = arith.addf %8, %13 : vector<128x128xf32>
    %15 = vector.extract_strided_slice %0 {offsets = [0, 2], sizes = [128, 1], strides = [1, 1]} : vector<128x4xi32> to vector<128x1xi32>
    %16 = vector.broadcast %15 : vector<128x1xi32> to vector<128x128xi32>
    %17 = arith.cmpi eq, %16, %1 : vector<128x128xi32>
    %18 = arith.extui %17 : vector<128x128xi1> to vector<128x128xi32>
    %19 = arith.sitofp %18 : vector<128x128xi32> to vector<128x128xf32>
    %20 = arith.addf %14, %19 : vector<128x128xf32>
    %21 = vector.extract_strided_slice %0 {offsets = [0, 3], sizes = [128, 1], strides = [1, 1]} : vector<128x4xi32> to vector<128x1xi32>
    %22 = vector.broadcast %21 : vector<128x1xi32> to vector<128x128xi32>
    %23 = arith.cmpi eq, %22, %1 : vector<128x128xi32>
    %24 = arith.extui %23 : vector<128x128xi1> to vector<128x128xi32>
    %25 = arith.sitofp %24 : vector<128x128xi32> to vector<128x128xf32>
    %26 = arith.addf %20, %25 : vector<128x128xf32>
    %cst_1 = arith.constant 2.500000e-01 : f32
    %27 = vector.broadcast %cst_1 : f32 to vector<128x128xf32>
    %28 = arith.mulf %26, %27 : vector<128x128xf32>
    %c0_2 = arith.constant 0 : index
    %c0_3 = arith.constant 0 : index
    %29 = vector.load %arg2[%c0_2, %c0_3] : memref<128x128xf32, #tpu.memory_space<vmem>>, vector<128x128xf32>
    %cst_4 = arith.constant dense<0.000000e+00> : vector<128x128xf32>
    %30 = tpu.matmul %28, %29, %cst_4 {dimension_numbers = #tpu.dot_dimension_numbers<[1], [0], [0], [1], [0, 0, 1, 1], [], []>} : vector<128x128xf32>, vector<128x128xf32>, vector<128x128xf32> -> vector<128x128xf32>
    %c0_5 = arith.constant 0 : index
    %c0_6 = arith.constant 0 : index
    %31 = vector.load %arg3[%c0_5, %c0_6] : memref<128x128xf32, #tpu.memory_space<vmem>>, vector<128x128xf32>
    %cst_7 = arith.constant dense<0.000000e+00> : vector<128x128xf32>
    %32 = tpu.matmul %30, %31, %cst_7 {dimension_numbers = #tpu.dot_dimension_numbers<[1], [0], [0], [1], [0, 0, 1, 1], [], []>} : vector<128x128xf32>, vector<128x128xf32>, vector<128x128xf32> -> vector<128x128xf32>
    %c0_8 = arith.constant 0 : index
    %c0_9 = arith.constant 0 : index
    %33 = vector.load %arg4[%c0_8, %c0_9] : memref<1x128xf32, #tpu.memory_space<vmem>>, vector<1x128xf32>
    %34 = vector.broadcast %33 : vector<1x128xf32> to vector<128x128xf32>
    %35 = arith.addf %32, %34 : vector<128x128xf32>
    %cst_10 = arith.constant 0.000000e+00 : f32
    %36 = vector.broadcast %cst_10 : f32 to vector<128x128xf32>
    %37 = arith.maximumf %35, %36 : vector<128x128xf32>
    %c0_11 = arith.constant 0 : index
    %c0_12 = arith.constant 0 : index
    %38 = vector.load %arg5[%c0_11, %c0_12] : memref<128x128xf32, #tpu.memory_space<vmem>>, vector<128x128xf32>
    %cst_13 = arith.constant dense<0.000000e+00> : vector<128x128xf32>
    %39 = tpu.matmul %37, %38, %cst_13 {dimension_numbers = #tpu.dot_dimension_numbers<[1], [0], [0], [1], [0, 0, 1, 1], [], []>} : vector<128x128xf32>, vector<128x128xf32>, vector<128x128xf32> -> vector<128x128xf32>
    %c0_14 = arith.constant 0 : index
    %c0_15 = arith.constant 0 : index
    %40 = vector.load %arg6[%c0_14, %c0_15] : memref<1x128xf32, #tpu.memory_space<vmem>>, vector<1x128xf32>
    %41 = vector.broadcast %40 : vector<1x128xf32> to vector<128x128xf32>
    %42 = arith.addf %39, %41 : vector<128x128xf32>
    %c0_16 = arith.constant 0 : index
    %c0_17 = arith.constant 0 : index
    %43 = vector.load %arg7[%c0_16, %c0_17] : memref<128x128xf32, #tpu.memory_space<vmem>>, vector<128x128xf32>
    %44 = arith.addf %42, %43 : vector<128x128xf32>
    %cst_18 = arith.constant dense<0xFF800000> : vector<128xf32>
    %45 = vector.multi_reduction <maximumf>, %44, %cst_18 [1] : vector<128x128xf32> to vector<128xf32>
    %46 = vector.shape_cast %45 : vector<128xf32> to vector<128x1xf32>
    %47 = vector.broadcast %46 : vector<128x1xf32> to vector<128x128xf32>
    %48 = arith.subf %44, %47 : vector<128x128xf32>
    %49 = math.exp %48 : vector<128x128xf32>
    %cst_19 = arith.constant dense<0.000000e+00> : vector<128xf32>
    %50 = vector.multi_reduction <add>, %49, %cst_19 [1] : vector<128x128xf32> to vector<128xf32>
    %51 = vector.shape_cast %50 : vector<128xf32> to vector<128x1xf32>
    %52 = tpu.reciprocal %51 {approx = true} : vector<128x1xf32> -> vector<128x1xf32>
    %53 = vector.broadcast %52 : vector<128x1xf32> to vector<128x128xf32>
    %54 = arith.mulf %49, %53 : vector<128x128xf32>
    %c0_20 = arith.constant 0 : index
    %c0_21 = arith.constant 0 : index
    %55 = vector.load %arg8[%c0_20, %c0_21] : memref<128x128xf32, #tpu.memory_space<vmem>>, vector<128x128xf32>
    tpu.vector_store %arg8[%c0_20, %c0_21], %54 {strides = array<i32>} : memref<128x128xf32, #tpu.memory_space<vmem>>, vector<128x128xf32>,
    return
  }
  func.func @transform_0(%arg0: i32) -> (i32, i32) {
    %c0_i32 = arith.constant 0 : i32
    %c0_i32_0 = arith.constant 0 : i32
    return %arg0, %c0_i32 : i32, i32
  }
  func.func @transform_1(%arg0: i32) -> (i32, i32) {
    %c0_i32 = arith.constant 0 : i32
    %c0_i32_0 = arith.constant 0 : i32
    %c0_i32_1 = arith.constant 0 : i32
    return %c0_i32, %c0_i32_0 : i32, i32
  }
  func.func @transform_2(%arg0: i32) -> (i32, i32) {
    %c0_i32 = arith.constant 0 : i32
    %c0_i32_0 = arith.constant 0 : i32
    %c0_i32_1 = arith.constant 0 : i32
    return %c0_i32, %c0_i32_0 : i32, i32
  }
  func.func @transform_3(%arg0: i32) -> (i32, i32) {
    %c0_i32 = arith.constant 0 : i32
    %c0_i32_0 = arith.constant 0 : i32
    %c0_i32_1 = arith.constant 0 : i32
    return %c0_i32, %c0_i32_0 : i32, i32
  }
  func.func @transform_4(%arg0: i32) -> (i32, i32) {
    %c0_i32 = arith.constant 0 : i32
    %c0_i32_0 = arith.constant 0 : i32
    %c0_i32_1 = arith.constant 0 : i32
    return %c0_i32, %c0_i32_0 : i32, i32
  }
  func.func @transform_5(%arg0: i32) -> (i32, i32) {
    %c0_i32 = arith.constant 0 : i32
    %c0_i32_0 = arith.constant 0 : i32
    %c0_i32_1 = arith.constant 0 : i32
    return %c0_i32, %c0_i32_0 : i32, i32
  }
  func.func @transform_6(%arg0: i32) -> (i32, i32) {
    %c0_i32 = arith.constant 0 : i32
    %c0_i32_0 = arith.constant 0 : i32
    return %arg0, %c0_i32 : i32, i32
  }
  func.func @transform_7(%arg0: i32) -> (i32, i32) {
    %c0_i32 = arith.constant 0 : i32
    %c0_i32_0 = arith.constant 0 : i32
    return %arg0, %c0_i32 : i32, i32
  }
}

</mosaic_0001>

<bundles_post_ra>
// kernel: tpu_custom_call.1
= control target key start
LH: loop header
LB: loop body
LE: loop exit
PB: predicated region body
PF: predicated region fallthrough
CT: control target
= control target key end

     0   :  { %s2579_s0 = inlined_call_operand.vmem [shape: s32[256,4], index: 0, kind: input, shape index: {}]   ;;  %s2580_s1 = inlined_call_operand.hbm [shape: f32[128,128], index: 1, kind: input, shape index: {}]   ;;  %s2581_s2 = inlined_call_operand.hbm [shape: f32[128,128], index: 2, kind: input, shape index: {}]   ;;  %s2582_s3 = inlined_call_operand.vmem [shape: f32[1,128], index: 3, kind: input, shape index: {}]   ;;  %s2583_s4 = inlined_call_operand.hbm [shape: f32[128,128], index: 4, kind: input, shape index: {}]   ;;  %s2584_s5 = inlined_call_operand.vmem [shape: f32[1,128], index: 5, kind: input, shape index: {}]   ;;  %s2585_s6 = inlined_call_operand.vmem [shape: f32[256,128], index: 6, kind: input, shape index: {}]   ;;  %s2586_s7 = inlined_call_operand.hbm [shape: f32[256,128], index: 7, kind: output, shape index: {}]  }
   0x1   :  { %2587 = sst [smem:[#allocation12_spill]] %s2580_s1 }
   0x2   :  { %12 = vsyncpa [#allocation3], 0 }
   0x3   :  { %13 = vsyncpa [#allocation6], 0 }
   0x4   :  { %14 = vsyncpa [#allocation4], 0 }
   0x5   :  { %16 = vsyncpa [#allocation4 + $0x1], 0  ;;  %s1963_s24 = smov 0   ;;  %s1965_s25 = smov 0  }
   0x6   :  { %s1967_s26 = smov 0   ;;  %s1969_s27 = smov 0  }
   0x7 LB: > { %s1984_s28 = sadd.s32 4294967295, %s1909_s27   ;;  %s1414_s29 = sadd.s32 4294967294, %s1909_s27   ;;  %s1909_s27 = sphi %s1969_s27, %s2596_s27   ;;  %s1905_s26 = sphi %s1967_s26, %s2595_s26   ;;  %s1901_s25 = sphi %s1965_s25, %s2594_s25   ;;  %s1897_s24 = sphi %s1963_s24, %s2593_s24  }
   0x8   : > { %s1988_s30 = sadd.s32 1, %s1909_s27   ;;  %s186_s8 = sadd.s32 1, %s1905_s26 }
   0x9   : > { %s183_s9 = ssub.s32 %s1909_s27, %s1988_s30  ;;  %p196_p0 = scmp.ne.s32.totalorder %s1905_s26, %s1901_s25 }
   0xa   : > { %p184_p1 = scmp.eq.s32.totalorder %s183_s9, 0  ;;  %p197_p2 = scmp.eq.s32.totalorder %s1984_s28, 1 }
   0xb   : > { %p202_p3 = scmp.ne.s32.totalorder %s1901_s25, %s1897_s24  ;;  %p203_p4 = scmp.eq.s32.totalorder %s1414_s29, 1 }
   0xc   : > { %s1999_s10 = scalar_select %p184_p1, %s1905_s26, %s186_s8  }
   0xd   : > { %p2001_p5 = por %p197_p2, %p196_p0  ;;  %p2005_p6 = por %p203_p4, %p202_p3 }
   0xe   : > { %p1415_p7 = scmp.ge.s32.totalorder %s1909_s27, 1  ;;  %p210_p8 = scmp.lt.s32.totalorder %s1909_s27, 3 }
   0xf   : > { %p1575_p9 = scmp.eq.s32.totalorder %s1984_s28, 0  ;;  %s235_s16 = sshll.u32 %s2581_s2, 4  ;;  %s236_s16 = int_to_ptr.hbm [resolvable:$true] %s235_s16 }
  0x10   : > { %p2012_p10 = pnand %p1415_p7, %p210_p8  ;;  %s2591_s1 = sld [smem:[#allocation12_spill]] }
  0x11   : > { %s1911_s21 = smov [#allocation5]   ;;  %s1912_s23 = smov 128  }
  0x12   : > { %p1561_p11 = pneg %p2012_p10  ;;  %s237_s22 = sshll.u32 %s1911_s21, 4  ;;  %s238_s22 = int_to_ptr.vmem [resolvable:$true] %s237_s22 }
  0x13   : > { %s1913_s29 = smov 8   ;;  %s1914_s8 = smov [#allocation2]  }
  0x14   : > { %p2026_p12 = pnand %p1575_p9, %p1561_p11  ;;  %s223_s9 = sshll.u32 %s1914_s8, 4  ;;  %s224_s9 = int_to_ptr.vmem [resolvable:$true] %s223_s9 }
  0x15   : > { %s252_s17 = sshll.u32 %s2583_s4, 4  ;;  %s1915_s18 = smov [#allocation7]   ;;  %s253_s17 = int_to_ptr.hbm [resolvable:$true] %s252_s17 }
  0x16   : > { %s221_s19 = sshll.u32 %s2591_s1, 4  ;;  %s254_s1 = sshll.u32 %s1915_s18, 4  ;;  %s222_s19 = int_to_ptr.hbm [resolvable:$true] %s221_s19  ;;  %s255_s1 = int_to_ptr.vmem [resolvable:$true] %s254_s1 }
  0x17   : > { %1567 = dma.hbm_to_vmem [thread:$0]  (!%p2026_p12), %s236_s16, 2048, %s238_s22, [#allocation6], %s1912_s23, %s1912_s23, %s1913_s29  }
  0x18   : > { %1564 = dma.hbm_to_vmem [thread:$0]  (!%p2026_p12), %s222_s19, 2048, %s224_s9, [#allocation3], %s1912_s23, %s1912_s23, %s1913_s29  }
  0x19   : > { %1570 = dma.hbm_to_vmem [thread:$0]  (!%p2026_p12), %s253_s17, 2048, %s255_s1, [#allocation6], %s1912_s23, %s1912_s23, %s1913_s29  }
  0x1a   : > { %291 = sbr.rel (%p2012_p10) target bundleno = 1040 (0x410), region = 48 }
  0x1f   : > { %1884 = dma.done.wait (%p1575_p9), [#allocation3], 2048  }
  0x20   : > { %1886 = vsyncadd (%p1575_p9), [#allocation3], 4294965248 }
  0x21   : > { %1888 = dma.done.wait (%p1575_p9), [#allocation6], 4096  }
  0x22   : > { %1890 = vsyncadd (%p1575_p9), [#allocation6], 4294963200  ;;  %s1425_s16 = sshll.u32 %s1984_s28, 4  ;;  %v1916_v0 = vmov 2   ;;  %v1917_v1 = vmov 1   ;;  %v1918_v2 = vmov 0   ;;  %v368_v42 = vlaneseq }
  0x23   : > { %1627 = vset.pattern.permute.xlu1 %v1916_v0  ;;  %1626 = vset.pattern.permute.xlu0 %v1917_v1  ;;  %p340_p13 = scmp.lt.s32.totalorder %s1425_s16, 31  ;;  %v1919_v6 = vmov 3   ;;  %v849_v15 = vld [vmem:[#allocation2 + $0x78] sm:$0xff]  ;;  %v848_v16 = vld [vmem:[#allocation2 + $0x70] sm:$0xff]  ;;  %v847_v18 = vld [vmem:[#allocation2 + $0x68] sm:$0xff]  ;;  %v1920_v47 = vmov 0.0  }
  0x24   : > { %1629 = vset.pattern.permute.xlu2 %v1918_v2  ;;  %850 = vmatpush.msra.mxu0 %v849_v15  ;;  %v846_v19 = vld [vmem:[#allocation2 + $0x60] sm:$0xff]  ;;  %v845_v20 = vld [vmem:[#allocation2 + $0x58] sm:$0xff]  ;;  %v844_v21 = vld [vmem:[#allocation2 + $0x50] sm:$0xff]  ;;  %v2139_v46 = vand.u32 127, %v368_v42  ;;  %s336_s15 = sand.u32 1, %s1901_s25   ;;  %s1859_s9 = scalar_lea.hbm %s2586_s7, 256 }
  0x25   : > { %s2598_s16 = smov (!%p340_p13, %s1425_s16), 31  ;;  %1499 = vmatpush.msra.mxu3 %v849_v15  ;;  %v843_v23 = vld [vmem:[#allocation2 + $0x48] sm:$0xff]  ;;  %v842_v24 = vld [vmem:[#allocation2 + $0x40] sm:$0xff]  ;;  %v841_v25 = vld [vmem:[#allocation2 + $0x38] sm:$0xff]  ;;  %s1424_s17 = sshll.u32 %s336_s15, 7 }
  0x26   : > { %s1426_s1 = sshll.u32 %s2598_s16, 3  ;;  %851 = vmatpush.msra.mxu0 %v848_v16  ;;  %v840_v27 = vld [vmem:[#allocation2 + $0x30] sm:$0xff]  ;;  %v839_v29 = vld [vmem:[#allocation2 + $0x28] sm:$0xff]  ;;  %v838_v30 = vld [vmem:[#allocation2 + $0x20] sm:$0xff]  ;;  %s2502_s18 = scalar_lea.vmem [#allocation8], %s1424_s17 }
  0x27   : > { %s2061_s20 = scalar_lea.vmem %s2579_s0, %s1426_s1  ;;  %1500 = vmatpush.msra.mxu3 %v848_v16  ;;  %v837_v31 = vld [vmem:[#allocation2 + $0x18] sm:$0xff]  ;;  %v836_v34 = vld [vmem:[#allocation2 + $0x10] sm:$0xff]  ;;  %v835_v36 = vld [vmem:[#allocation2 + $0x8] sm:$0xff]  ;;  %s2362_s14 = scalar_lea.vmem %s2585_s6, %s1426_s1 }
  0x28   : > { %v353_v3 = vld [vmem:[%s2061_s20 + $0x8] sm:$0xff]  ;;  %v352_v4 = vld [vmem:[%s2061_s20] sm:$0xff]  ;;  %v354_v8 = vld [vmem:[%s2061_s20 + $0x10] sm:$0xff]  ;;  %852 = vmatpush.msra.mxu0 %v847_v18  ;;  %s1498_s16 = sshll.u32 %s1984_s28, 7  ;;  %s1294_s28 = scalar_lea.sflag [#allocation4], %s336_s15 }
  0x29   : > { %374 = vperm.xlu2 %1629, %v353_v3   ;;  %595 = vperm.xlu1 %1627, %v352_v4   ;;  %v356_v5 = vld [vmem:[%s2061_s20 + $0x20] sm:$0xff]  ;;  %v2070_v7 = vld [vmem:[%s2061_s20 + $0x68] sm:$0xff]  ;;  %v355_v9 = vld [vmem:[%s2061_s20 + $0x18] sm:$0xff]  ;;  %s1305_s19 = scalar_lea.hbm %s2586_s7, %s1498_s16 }
  0x2a   : > { %483 = vperm.xlu0 %1626, %v352_v4   ;;  %v2083_v10 = vld [vmem:[%s2061_s20 + $0x70] sm:$0xff]  ;;  %v364_v11 = vld [vmem:[%s2061_s20 + $0x60] sm:$0xff]  ;;  %v357_v12 = vld [vmem:[%s2061_s20 + $0x28] sm:$0xff]  ;;  %1501 = vmatpush.msra.mxu3 %v847_v18  ;;  %s1308_s21 = sshll.u32 %s1305_s19, 4  ;;  %s1309_s21 = int_to_ptr.hbm [resolvable:$true] %s1308_s21 }
  0x2b   : > { %v2096_v13 = vld [vmem:[%s2061_s20 + $0x48] sm:$0xff]  ;;  %v358_v14 = vld [vmem:[%s2061_s20 + $0x30] sm:$0xff]  ;;  %853 = vmatpush.msra.mxu0 %v846_v19  ;;  %v359_v26 = vld [vmem:[%s2061_s20 + $0x38] sm:$0xff]  ;;  %s1853_s22 = sshra.s32 %s1309_s21, 4  ;;  %s1854_s22 = int_to_ptr.hbm [resolvable:$true] %s1853_s22 }
  0x2c   : > { %1502 = vmatpush.msra.mxu3 %v846_v19  ;;  %v834_v37 = vld [vmem:[#allocation2] sm:$0xff]  ;;  %v367_v42 = vld [vmem:[%s2061_s20 + $0x78] sm:$0xff]  ;;  %s1855_s23 = scalar_lea.hbm %s1854_s22, 128  ;;  %p1860_p3 = scmp.lt.s32.totalorder %s1854_s22, %s2586_s7 }
  0x2d   : > { %854 = vmatpush.msra.mxu0 %v845_v20  ;;  %v360_v44 = vld [vmem:[%s2061_s20 + $0x40] sm:$0xff]  ;;  %p1856_p0 = scmp.ne.s32.totalorder %s1854_s22, %s1855_s23  ;;  %p1861_p4 = scmp.lt.s32.totalorder %s1859_s9, %s1855_s23 }
  0x2e   : > { %1503 = vmatpush.msra.mxu3 %v845_v20 }
  0x2f   : > { %855 = vmatpush.msra.mxu0 %v844_v21  ;;  %p1857_p1 = pnand %p1856_p0, %p2001_p5  ;;  %p1862_p7 = por %p1861_p4, %p1860_p3 }
  0x30   : > { %1504 = vmatpush.msra.mxu3 %v844_v21 }
  0x31   : > { %1630 = vset.pattern.permute.xlu2 %v1917_v1  ;;  %1628 = vset.pattern.permute.xlu1 %v1919_v6  ;;  %p1858_p2 = pneg %p1857_p1 }
  0x32   : > { %1641 = vset.pattern.permute.xlu0 %v1916_v0  ;;  %486 = vperm.xlu2 %1630, %v353_v3  }
  0x33   : > { %707 = vperm.xlu1 %1628, %v352_v4   ;;  %607 = vperm.xlu0 %1641, %v356_v5   ;;  %p1863_p8 = pnand %p1862_p7, %p1858_p2 }
  0x34   : > { %856 = vmatpush.msra.mxu0 %v843_v23  ;;  %1505 = vmatpush.msra.mxu3 %v843_v23 }
  0x36   : > { %857 = vmatpush.msra.mxu0 %v842_v24  ;;  %1506 = vmatpush.msra.mxu3 %v842_v24  ;;  %v2188_v24 = vld [vmem:[%s2061_s20 + $0x50] sm:$0xff] }
  0x38   : > { %858 = vmatpush.msra.mxu0 %v841_v25  ;;  %1507 = vmatpush.msra.mxu3 %v841_v25 }
  0x3a   : > { %1632 = vset.pattern.permute.xlu2 %v1919_v6  ;;  %859 = vmatpush.msra.mxu0 %v840_v27 }
  0x3b   : > { %1631 = vset.pattern.permute.xlu1 %v1916_v0  ;;  %634 = vperm.xlu0 %1641, %v2070_v7  }
  0x3c   : > { %710 = vperm.xlu2 %1632, %v353_v3   ;;  %598 = vperm.xlu1 %1631, %v353_v3  }
  0x3d   : > { %1508 = vmatpush.msra.mxu3 %v840_v27  ;;  %860 = vmatpush.msra.mxu0 %v839_v29 }
  0x3f   : > { %1509 = vmatpush.msra.mxu3 %v839_v29  ;;  %861 = vmatpush.msra.mxu0 %v838_v30 }
  0x41   : > { %1510 = vmatpush.msra.mxu3 %v838_v30  ;;  %862 = vmatpush.msra.mxu0 %v837_v31 }
  0x43   : > { %1658 = vset.pattern.permute.xlu0 %v1918_v2  ;;  %1511 = vmatpush.msra.mxu3 %v837_v31 }
  0x44   : > { %1634 = vset.pattern.permute.xlu2 %v1916_v0  ;;  %1633 = vset.pattern.permute.xlu1 %v1917_v1 }
  0x45   : > { %371 = vperm.xlu0 %1658, %v352_v4   ;;  %601 = vperm.xlu2 %1634, %v354_v8  }
  0x46   : > { %489 = vperm.xlu1 %1633, %v354_v8   ;;  %863 = vmatpush.msra.mxu0 %v836_v34 }
  0x47   : > { %1512 = vmatpush.msra.mxu3 %v836_v34 }
  0x48   : > { %864 = vmatpush.msra.mxu0 %v835_v36 }
  0x49   : > { %1513 = vmatpush.msra.mxu3 %v835_v36 }
  0x4a   : > { %865 = vmatpush.msra.mxu0 %v834_v37 }
  0x4b   : > { %1514 = vmatpush.msra.mxu3 %v834_v37 }
  0x4d   : > { %377 = vperm.xlu0 %1658, %v354_v8   ;;  %1636 = vset.pattern.permute.xlu2 %v1918_v2 }
  0x4e   : > { %1635 = vset.pattern.permute.xlu1 %v1919_v6  ;;  %380 = vperm.xlu2 %1636, %v355_v9  }
  0x4f   : > { %713 = vperm.xlu1 %1635, %v354_v8  }
  0x55   : > { %413 = vperm.xlu0 %1658, %v2083_v10  }
  0x56   : > { %1638 = vset.pattern.permute.xlu2 %v1919_v6 }
  0x57   : > { %1637 = vset.pattern.permute.xlu1 %v1916_v0  ;;  %716 = vperm.xlu2 %1638, %v355_v9  }
  0x58   : > { %604 = vperm.xlu1 %1637, %v355_v9  }
  0x5d   : > { %1663 = vset.pattern.permute.xlu0 %v1917_v1 }
  0x5e   : > { %492 = vperm.xlu0 %1663, %v355_v9  }
  0x5f   : > { %1640 = vset.pattern.permute.xlu2 %v1917_v1 }
  0x60   : > { %1639 = vset.pattern.permute.xlu1 %v1918_v2  ;;  %495 = vperm.xlu2 %1640, %v356_v5  }
  0x61   : > { %383 = vperm.xlu1 %1639, %v356_v5  }
  0x66   : > { %519 = vperm.xlu0 %1663, %v364_v11  }
  0x68   : > { %1643 = vset.pattern.permute.xlu2 %v1918_v2 }
  0x69   : > { %1642 = vset.pattern.permute.xlu1 %v1919_v6  ;;  %386 = vperm.xlu2 %1643, %v357_v12  }
  0x6a   : > { %719 = vperm.xlu1 %1642, %v356_v5  }
  0x6e   : > { %510 = vperm.xlu0 %1663, %v2096_v13  }
  0x71   : > { %1645 = vset.pattern.permute.xlu2 %v1916_v0 }
  0x72   : > { %1644 = vset.pattern.permute.xlu1 %v1917_v1  ;;  %610 = vperm.xlu2 %1645, %v357_v12  }
  0x73   : > { %498 = vperm.xlu1 %1644, %v357_v12  }
  0x76   : > { %1668 = vset.pattern.permute.xlu0 %v1919_v6 }
  0x77   : > { %722 = vperm.xlu0 %1668, %v357_v12  }
  0x7a   : > { %1647 = vset.pattern.permute.xlu2 %v1917_v1 }
  0x7b   : > { %1646 = vset.pattern.permute.xlu1 %v1918_v2  ;;  %501 = vperm.xlu2 %1647, %v358_v14  }
  0x7c   : > { %389 = vperm.xlu1 %1646, %v358_v14  }
  0x7f   : > { %743 = vperm.xlu0 %1668, %v364_v11  }
  0x83   : > { %1649 = vset.pattern.permute.xlu2 %v1918_v2  ;;  %v2106_v17 = vpop.permute.xlu2 %374 }
  0x84   : > { %1648 = vset.pattern.permute.xlu1 %v1916_v0  ;;  %407 = vperm.xlu2 %1649, %v364_v11   ;;  %vm419_vm1 = vcmp.eq.s32.totalorder %v2106_v17, %v2139_v46 }
  0x85   : > { %613 = vperm.xlu1 %1648, %v358_v14   ;;  %v1430_v54 = vsel %vm419_vm1, 1.0, %v1920_v47 }
  0x87   : > { %734 = vperm.xlu0 %1668, %v2096_v13  }
  0x8c   : > { %1651 = vset.pattern.permute.xlu2 %v1916_v0  ;;  %v2111_v22 = vpop.permute.xlu2 %486 }
  0x8d   : > { %1650 = vset.pattern.permute.xlu1 %v1919_v6  ;;  %631 = vperm.xlu2 %1651, %v364_v11   ;;  %vm531_vm3 = vcmp.eq.s32.totalorder %v2111_v22, %v2139_v46 }
  0x8e   : > { %725 = vperm.xlu1 %1650, %v358_v14   ;;  %v1446_v56 = vsel %vm531_vm3, 1.0, %v1920_v47 }
  0x8f   : > { %1677 = vset.pattern.permute.xlu0 %v1916_v0  ;;  %v579_v60 = vadd.f32 %v1446_v56, %v1430_v54 }
  0x90   : > { %625 = vperm.xlu0 %1677, %v2188_v24  }
  0x95   : > { %1653 = vset.pattern.permute.xlu2 %v1917_v1 }
  0x96   : > { %1652 = vset.pattern.permute.xlu1 %v1918_v2  ;;  %504 = vperm.xlu2 %1653, %v359_v26   ;;  %v2118_v28 = vpop.permute.xlu2 %710 }
  0x97   : > { %392 = vperm.xlu1 %1652, %v359_v26   ;;  %vm755_vm7 = vcmp.eq.s32.totalorder %v2118_v28, %v2139_v46 }
  0x98   : > { %v1478_v4 = vsel %vm755_vm7, 1.0, %v1920_v47  ;;  %1682 = vset.pattern.permute.xlu0 %v1919_v6 }
  0x9b   : > { %v596_v32 = vpop.permute.xlu1 %595 }
  0x9c   : > { %v484_v33 = vpop.permute.xlu0 %483  ;;  %vm642_vm2 = vcmp.eq.s32.totalorder %v596_v32, %v2139_v46 }
  0x9d   : > { %vm530_vm0 = vcmp.eq.s32.totalorder %v484_v33, %v2139_v46  ;;  %v1461_v55 = vsel %vm642_vm2, 1.0, %v1920_v47 }
  0x9e   : > { %1655 = vset.pattern.permute.xlu2 %v1918_v2  ;;  %v1445_v48 = vsel %vm530_vm0, 1.0, %v1920_v47 }
  0x9f   : > { %1654 = vset.pattern.permute.xlu1 %v1916_v0  ;;  %410 = vperm.xlu2 %1655, %v2070_v7   ;;  %v2123_v35 = vpop.permute.xlu2 %601 }
  0xa0   : > { %616 = vperm.xlu1 %1654, %v359_v26   ;;  %vm644_vm10 = vcmp.eq.s32.totalorder %v2123_v35, %v2139_v46 }
  0xa1   : > { %v1463_v14 = vsel %vm644_vm10, 1.0, %v1920_v47 }
  0xa5   : > { %v708_v38 = vpop.permute.xlu1 %707  ;;  %v2125_v39 = vpop.permute.xlu0 %607 }
  0xa6   : > { %vm754_vm5 = vcmp.eq.s32.totalorder %v708_v38, %v2139_v46  ;;  %vm646_vm2 = vcmp.eq.s32.totalorder %v2125_v39, %v2139_v46 }
  0xa7   : > { %1657 = vset.pattern.permute.xlu2 %v1919_v6  ;;  %v1477_v58 = vsel %vm754_vm5, 1.0, %v1920_v47 }
  0xa8   : > { %1656 = vset.pattern.permute.xlu1 %v1917_v1  ;;  %728 = vperm.xlu2 %1657, %v359_v26   ;;  %v2129_v40 = vpop.permute.xlu2 %380 }
  0xa9   : > { %522 = vperm.xlu1 %1656, %v2070_v7   ;;  %vm421_vm12 = vcmp.eq.s32.totalorder %v2129_v40, %v2139_v46 }
  0xaa   : > { %v1432_v25 = vsel %vm421_vm12, 1.0, %v1920_v47 }
  0xad   : > { %v2132_v41 = vpop.permute.xlu0 %634 }
  0xae   : > { %v599_v43 = vpop.permute.xlu1 %598 }
  0xaf   : > { %vm643_vm6 = vcmp.eq.s32.totalorder %v599_v43, %v2139_v46 }
  0xb0   : > { %1660 = vset.pattern.permute.xlu2 %v1917_v1  ;;  %v1462_v59 = vsel %vm643_vm6, 1.0, %v1920_v47 }
  0xb1   : > { %1659 = vset.pattern.permute.xlu1 %v1918_v2  ;;  %507 = vperm.xlu2 %1660, %v360_v44   ;;  %v2137_v45 = vpop.permute.xlu2 %716  ;;  %v691_v63 = vadd.f32 %v1462_v59, %v579_v60 }
  0xb2   : > { %395 = vperm.xlu1 %1659, %v360_v44   ;;  %vm757_vm15 = vcmp.eq.s32.totalorder %v2137_v45, %v2139_v46 }
  0xb3   : > { %v803_v12 = vadd.f32 %v1478_v4, %v691_v63  ;;  %v1480_v32 = vsel %vm757_vm15, 1.0, %v1920_v47 }
  0xb5   : > { %v819_v16 = vmul.f32 0.25, %v803_v12 }
  0xb7   : > { %v372_v49 = vpop.permute.xlu0 %371 }
  0xb8   : > { %vm418_vm4 = vcmp.eq.s32.totalorder %v372_v49, %v2139_v46  ;;  %v490_v50 = vpop.permute.xlu1 %489  ;;  %v2222_v49 = vld [vmem:[%s2061_s20 + $0x58] sm:$0xff]  ;;  %s1306_s20 = sshll.u32 %s2502_s18, 4  ;;  %s1307_s20 = int_to_ptr.vmem [resolvable:$true] %s1306_s20 }
  0xb9   : > { %v1429_v51 = vsel %vm418_vm4, 1.0, %v1920_v47  ;;  %1662 = vset.pattern.permute.xlu2 %v1916_v0  ;;  %vm532_vm8 = vcmp.eq.s32.totalorder %v490_v50, %v2139_v46  ;;  %740 = vperm.xlu0 %1682, %v2222_v49  }
  0xba   : > { %v578_v52 = vadd.f32 %v1445_v48, %v1429_v51  ;;  %1661 = vset.pattern.permute.xlu1 %v1919_v6  ;;  %619 = vperm.xlu2 %1662, %v360_v44   ;;  %v2154_v53 = vpop.permute.xlu2 %495  ;;  %v1447_v8 = vsel %vm532_vm8, 1.0, %v1920_v47 }
  0xbb   : > { %746 = vperm.xlu1 %1661, %v2070_v7   ;;  %vm534_vm0 = vcmp.eq.s32.totalorder %v2154_v53, %v2139_v46 }
  0xbc   : > { %v690_v57 = vadd.f32 %v1461_v55, %v578_v52  ;;  %v1449_v33 = vsel %vm534_vm0, 1.0, %v1920_v47 }
  0xbe   : > { %v802_v61 = vadd.f32 %v1477_v58, %v690_v57 }
  0xbf   : > { %v378_v62 = vpop.permute.xlu0 %377 }
  0xc0   : > { %vm420_vm9 = vcmp.eq.s32.totalorder %v378_v62, %v2139_v46  ;;  %v818_v3 = vmul.f32 0.25, %v802_v61 }
  0xc1   : > { %v1431_v5 = vsel %vm420_vm9, 1.0, %v1920_v47  ;;  %v714_v7 = vpop.permute.xlu1 %713 }
  0xc2   : > { %866 = vmatmul.f32.vlgmr.msra.gmra.mxu0 %v818_v3  ;;  %1665 = vset.pattern.permute.xlu2 %v1919_v6  ;;  %v580_v11 = vadd.f32 %v1447_v8, %v1431_v5  ;;  %vm756_vm11 = vcmp.eq.s32.totalorder %v714_v7, %v2139_v46 }
  0xc3   : > { %1664 = vset.pattern.permute.xlu1 %v1917_v1  ;;  %731 = vperm.xlu2 %1665, %v360_v44   ;;  %v2171_v9 = vpop.permute.xlu2 %386  ;;  %v1479_v19 = vsel %vm756_vm11, 1.0, %v1920_v47 }
  0xc4   : > { %525 = vperm.xlu1 %1664, %v2083_v10   ;;  %v692_v17 = vadd.f32 %v1463_v14, %v580_v11  ;;  %vm423_vm4 = vcmp.eq.s32.totalorder %v2171_v9, %v2139_v46 }
  0xc5   : > { %v1434_v51 = vsel %vm423_vm4, 1.0, %v1920_v47 }
  0xc6   : > { %v804_v20 = vadd.f32 %v1479_v19, %v692_v17 }
  0xc7   : > { %v2177_v15 = vpop.permute.xlu0 %413 }
  0xc8   : > { %v820_v23 = vmul.f32 0.25, %v804_v20 }
  0xca   : > { %v605_v18 = vpop.permute.xlu1 %604  ;;  %869 = vmatmul.f32.gmra.mxu0 %v819_v16 }
  0xcb   : > { %1667 = vset.pattern.permute.xlu2 %v1918_v2  ;;  %vm645_vm13 = vcmp.eq.s32.totalorder %v605_v18, %v2139_v46 }
  0xcc   : > { %1666 = vset.pattern.permute.xlu1 %v1916_v0  ;;  %398 = vperm.xlu2 %1667, %v2096_v13   ;;  %v611_v21 = vpop.permute.xlu2 %610  ;;  %v1464_v29 = vsel %vm645_vm13, 1.0, %v1920_v47 }
  0xcd   : > { %637 = vperm.xlu1 %1666, %v2083_v10   ;;  %vm647_vm5 = vcmp.eq.s32.totalorder %v611_v21, %v2139_v46  ;;  %v930_v21 = vld [vmem:[#allocation5 + $0x78] sm:$0xff] }
  0xce   : > { %v1466_v52 = vsel %vm647_vm5, 1.0, %v1920_v47  ;;  %935 = vmatpush.msra.mxu1 %v930_v21  ;;  %1515 = vmatpush.msrb.mxu3 %v930_v21 }
  0xd0   : > { %v493_v22 = vpop.permute.xlu0 %492 }
  0xd1   : > { %vm533_vm14 = vcmp.eq.s32.totalorder %v493_v22, %v2139_v46 }
  0xd2   : > { %v1448_v26 = vsel %vm533_vm14, 1.0, %v1920_v47  ;;  %872 = vmatmul.f32.gmra.mxu0 %v820_v23 }
  0xd3   : > { %v581_v27 = vadd.f32 %v1448_v26, %v1432_v25  ;;  %v384_v28 = vpop.permute.xlu1 %383  ;;  %v928_v26 = vld [vmem:[#allocation5 + $0x68] sm:$0xff] }
  0xd4   : > { %vm422_vm1 = vcmp.eq.s32.totalorder %v384_v28, %v2139_v46  ;;  %1670 = vset.pattern.permute.xlu2 %v1916_v0  ;;  %v927_v28 = vld [vmem:[#allocation5 + $0x60] sm:$0xff] }
  0xd5   : > { %1669 = vset.pattern.permute.xlu1 %v1919_v6  ;;  %622 = vperm.xlu2 %1670, %v2096_v13   ;;  %v693_v30 = vadd.f32 %v1464_v29, %v581_v27  ;;  %v2204_v31 = vpop.permute.xlu2 %501  ;;  %v1433_v34 = vsel %vm422_vm1, 1.0, %v1920_v47  ;;  %v1465_v13 = vsel %vm646_vm2, 1.0, %v1920_v47  ;;  %v926_v29 = vld [vmem:[#allocation5 + $0x58] sm:$0xff] }
  0xd6   : > { %749 = vperm.xlu1 %1669, %v2083_v10   ;;  %v582_v37 = vadd.f32 %v1449_v33, %v1433_v34  ;;  %vm536_vm12 = vcmp.eq.s32.totalorder %v2204_v31, %v2139_v46  ;;  %v924_v31 = vld [vmem:[#allocation5 + $0x48] sm:$0xff] }
  0xd7   : > { %v805_v35 = vadd.f32 %v1480_v32, %v693_v30  ;;  %v1451_v17 = vsel %vm536_vm12, 1.0, %v1920_v47  ;;  %v925_v30 = vld [vmem:[#allocation5 + $0x50] sm:$0xff]  ;;  %v923_v32 = vld [vmem:[#allocation5 + $0x40] sm:$0xff]  ;;  %vm655_vm12 = vcmp.eq.s32.totalorder %v2132_v41, %v2139_v46 }
  0xd8   : > { %v520_v36 = vpop.permute.xlu0 %519  ;;  %v694_v43 = vadd.f32 %v1465_v13, %v582_v37  ;;  %v921_v37 = vld [vmem:[#allocation5 + $0x30] sm:$0xff] }
  0xd9   : > { %v821_v38 = vmul.f32 0.25, %v805_v35  ;;  %vm542_vm6 = vcmp.eq.s32.totalorder %v520_v36, %v2139_v46  ;;  %v922_v35 = vld [vmem:[#allocation5 + $0x38] sm:$0xff] }
  0xda   : > { %v1457_v56 = vsel %vm542_vm6, 1.0, %v1920_v47 }
  0xdb   : > { %875 = vmatmul.f32.gmra.mxu0 %v821_v38 }
  0xdc   : > { %v720_v40 = vpop.permute.xlu1 %719 }
  0xdd   : > { %vm758_vm3 = vcmp.eq.s32.totalorder %v720_v40, %v2139_v46  ;;  %1672 = vset.pattern.permute.xlu2 %v1917_v1 }
  0xde   : > { %v1481_v10 = vsel %vm758_vm3, 1.0, %v1920_v47  ;;  %1671 = vset.pattern.permute.xlu1 %v1918_v2  ;;  %v408_v39 = vpop.permute.xlu2 %407  ;;  %528 = vperm.xlu2 %1672, %v367_v42  }
  0xdf   : > { %416 = vperm.xlu1 %1671, %v367_v42   ;;  %v806_v44 = vadd.f32 %v1481_v10, %v694_v43  ;;  %vm430_vm8 = vcmp.eq.s32.totalorder %v408_v39, %v2139_v46  ;;  %v920_v43 = vld [vmem:[#allocation5 + $0x28] sm:$0xff]  ;;  %v919_v39 = vld [vmem:[#allocation5 + $0x20] sm:$0xff] }
  0xe0   : > { %v2219_v45 = vpop.permute.xlu0 %510  ;;  %v1441_v57 = vsel %vm430_vm8, 1.0, %v1920_v47 }
  0xe1   : > { %v822_v48 = vmul.f32 0.25, %v806_v44  ;;  %v590_v61 = vadd.f32 %v1457_v56, %v1441_v57 }
  0xe3   : > { %878 = vmatmul.f32.gmra.mxu0 %v822_v48  ;;  %v918_v48 = vld [vmem:[#allocation5 + $0x18] sm:$0xff] }
  0xe5   : > { %v499_v50 = vpop.permute.xlu1 %498 }
  0xe6   : > { %vm535_vm7 = vcmp.eq.s32.totalorder %v499_v50, %v2139_v46  ;;  %1674 = vset.pattern.permute.xlu2 %v1918_v2  ;;  %v917_v50 = vld [vmem:[#allocation5 + $0x10] sm:$0xff] }
  0xe7   : > { %v1450_v53 = vsel %vm535_vm7, 1.0, %v1920_v47  ;;  %1673 = vset.pattern.permute.xlu1 %v1916_v0  ;;  %v632_v54 = vpop.permute.xlu2 %631  ;;  %401 = vperm.xlu2 %1674, %v2188_v24  }
  0xe8   : > { %v583_v55 = vadd.f32 %v1450_v53, %v1434_v51  ;;  %640 = vperm.xlu1 %1673, %v367_v42   ;;  %vm654_vm10 = vcmp.eq.s32.totalorder %v632_v54, %v2139_v46  ;;  %v915_v54 = vld [vmem:[#allocation5] sm:$0xff] }
  0xe9   : > { %v723_v58 = vpop.permute.xlu0 %722  ;;  %v1473_v63 = vsel %vm654_vm10, 1.0, %v1920_v47  ;;  %vm539_vm10 = vcmp.eq.s32.totalorder %v2219_v45, %v2139_v46 }
  0xea   : > { %vm759_vm9 = vcmp.eq.s32.totalorder %v723_v58, %v2139_v46  ;;  %v695_v59 = vadd.f32 %v1466_v52, %v583_v55  ;;  %v702_v5 = vadd.f32 %v1473_v63, %v590_v61  ;;  %v916_v52 = vld [vmem:[#allocation5 + $0x8] sm:$0xff] }
  0xeb   : > { %v1482_v60 = vsel %vm759_vm9, 1.0, %v1920_v47 }
  0xec   : > { %v807_v62 = vadd.f32 %v1482_v60, %v695_v59 }
  0xee   : > { %v390_v3 = vpop.permute.xlu1 %389  ;;  %v823_v4 = vmul.f32 0.25, %v807_v62 }
  0xef   : > { %1676 = vset.pattern.permute.xlu2 %v1919_v6  ;;  %vm424_vm13 = vcmp.eq.s32.totalorder %v390_v3, %v2139_v46 }
  0xf0   : > { %1675 = vset.pattern.permute.xlu1 %v1917_v1  ;;  %881 = vmatmul.f32.gmra.mxu0 %v823_v4  ;;  %v505_v7 = vpop.permute.xlu2 %504  ;;  %v1435_v18 = vsel %vm424_vm13, 1.0, %v1920_v47 }
  0xf1   : > { %513 = vperm.xlu1 %1675, %v2188_v24   ;;  %v744_v8 = vpop.permute.xlu0 %743  ;;  %752 = vperm.xlu2 %1676, %v367_v42   ;;  %v584_v20 = vadd.f32 %v1451_v17, %v1435_v18  ;;  %vm537_vm0 = vcmp.eq.s32.totalorder %v505_v7, %v2139_v46 }
  0xf2   : > { %vm766_vm11 = vcmp.eq.s32.totalorder %v744_v8, %v2139_v46  ;;  %v1452_v33 = vsel %vm537_vm0, 1.0, %v1920_v47 }
  0xf3   : > { %v1489_v9 = vsel %vm766_vm11, 1.0, %v1920_v47 }
  0xf4   : > { %v814_v11 = vadd.f32 %v1489_v9, %v702_v5  ;;  %v1454_v5 = vsel %vm539_vm10, 1.0, %v1920_v47 }
  0xf6   : > { %v830_v12 = vmul.f32 0.25, %v814_v11  ;;  %v1474_v11 = vsel %vm655_vm12, 1.0, %v1920_v47 }
  0xf7   : > { %v614_v14 = vpop.permute.xlu1 %613 }
  0xf8   : > { %902 = vmatmul.f32.vlgmr.msra.gmra.mxu3 %v830_v12  ;;  %vm648_vm14 = vcmp.eq.s32.totalorder %v614_v14, %v2139_v46 }
  0xf9   : > { %1678 = vset.pattern.permute.xlu1 %v1919_v6  ;;  %v2252_v16 = vpop.permute.xlu2 %410  ;;  %1679 = vset.pattern.permute.xlu2 %v1918_v2  ;;  %v1467_v19 = vsel %vm648_vm14, 1.0, %v1920_v47  ;;  %v929_v2 = vld [vmem:[#allocation5 + $0x70] sm:$0xff]  ;;  %v735_v9 = vpop.permute.xlu0 %734 }
  0xfa   : > { %737 = vperm.xlu1 %1678, %v2188_v24   ;;  %404 = vperm.xlu2 %1679, %v2222_v49   ;;  %v696_v6 = vadd.f32 %v1467_v19, %v584_v20  ;;  %vm431_vm9 = vcmp.eq.s32.totalorder %v2252_v16, %v2139_v46  ;;  %vm763_vm14 = vcmp.eq.s32.totalorder %v735_v9, %v2139_v46 }
  0xfb   : > { %936 = vmatpush.msra.mxu1 %v929_v2  ;;  %1516 = vmatpush.msrb.mxu3 %v929_v2  ;;  %v1442_v63 = vsel %vm431_vm9, 1.0, %v1920_v47  ;;  %v1486_v20 = vsel %vm763_vm14, 1.0, %v1920_v47 }
  0xfd   : > { %937 = vmatpush.msra.mxu1 %v928_v26  ;;  %1517 = vmatpush.msrb.mxu3 %v928_v26 }
  0xff   : > { %938 = vmatpush.msra.mxu1 %v927_v28  ;;  %1518 = vmatpush.msrb.mxu3 %v927_v28 }
 0x100   : > { %v726_v22 = vpop.permute.xlu1 %725 }
 0x101   : > { %vm760_vm15 = vcmp.eq.s32.totalorder %v726_v22, %v2139_v46  ;;  %939 = vmatpush.msra.mxu1 %v926_v29  ;;  %1519 = vmatpush.msrb.mxu3 %v926_v29 }
 0x102   : > { %v1483_v23 = vsel %vm760_vm15, 1.0, %v1920_v47  ;;  %1680 = vset.pattern.permute.xlu1 %v1917_v1  ;;  %v729_v24 = vpop.permute.xlu2 %728  ;;  %1681 = vset.pattern.permute.xlu2 %v1916_v0 }
 0x103   : > { %516 = vperm.xlu1 %1680, %v2222_v49   ;;  %v808_v25 = vadd.f32 %v1483_v23, %v696_v6  ;;  %628 = vperm.xlu2 %1681, %v2222_v49   ;;  %vm761_vm2 = vcmp.eq.s32.totalorder %v729_v24, %v2139_v46 }
 0x104   : > { %940 = vmatpush.msra.mxu1 %v925_v30  ;;  %1520 = vmatpush.msrb.mxu3 %v925_v30  ;;  %v1484_v13 = vsel %vm761_vm2, 1.0, %v1920_v47 }
 0x105   : > { %v824_v27 = vmul.f32 0.25, %v808_v25 }
 0x106   : > { %941 = vmatpush.msra.mxu1 %v924_v31  ;;  %1521 = vmatpush.msrb.mxu3 %v924_v31 }
 0x107   : > { %884 = vmatmul.f32.gmra.mxu0 %v824_v27 }
 0x108   : > { %942 = vmatpush.msra.mxu1 %v923_v32  ;;  %1522 = vmatpush.msrb.mxu3 %v923_v32 }
 0x109   : > { %v393_v1 = vpop.permute.xlu1 %392 }
 0x10a   : > { %vm425_vm1 = vcmp.eq.s32.totalorder %v393_v1, %v2139_v46  ;;  %943 = vmatpush.msra.mxu1 %v922_v35  ;;  %1523 = vmatpush.msrb.mxu3 %v922_v35 }
 0x10b   : > { %v508_v0 = vpop.permute.xlu2 %507  ;;  %v1436_v34 = vsel %vm425_vm1, 1.0, %v1920_v47  ;;  %vm432_vm1 = vcmp.eq.s32.totalorder %v2177_v15, %v2139_v46 }
 0x10c   : > { %v585_v38 = vadd.f32 %v1452_v33, %v1436_v34  ;;  %944 = vmatpush.msra.mxu1 %v921_v37  ;;  %1524 = vmatpush.msrb.mxu3 %v921_v37  ;;  %vm538_vm4 = vcmp.eq.s32.totalorder %v508_v0, %v2139_v46  ;;  %v1443_v28 = vsel %vm432_vm1, 1.0, %v1920_v47 }
 0x10d   : > { %v1453_v55 = vsel %vm538_vm4, 1.0, %v1920_v47 }
 0x10e   : > { %945 = vmatpush.msra.mxu1 %v920_v43  ;;  %1525 = vmatpush.msrb.mxu3 %v920_v43 }
 0x110   : > { %946 = vmatpush.msra.mxu1 %v919_v39  ;;  %1526 = vmatpush.msrb.mxu3 %v919_v39 }
 0x112   : > { %v617_v36 = vpop.permute.xlu1 %616  ;;  %947 = vmatpush.msra.mxu1 %v918_v48  ;;  %1527 = vmatpush.msrb.mxu3 %v918_v48 }
 0x113   : > { %vm649_vm3 = vcmp.eq.s32.totalorder %v617_v36, %v2139_v46 }
 0x114   : > { %v1468_v40 = vsel %vm649_vm3, 1.0, %v1920_v47  ;;  %v620_v42 = vpop.permute.xlu2 %619  ;;  %948 = vmatpush.msra.mxu1 %v917_v50  ;;  %1528 = vmatpush.msrb.mxu3 %v917_v50 }
 0x115   : > { %v697_v10 = vadd.f32 %v1468_v40, %v585_v38  ;;  %vm650_vm5 = vcmp.eq.s32.totalorder %v620_v42, %v2139_v46 }
 0x116   : > { %949 = vmatpush.msra.mxu1 %v916_v52  ;;  %1529 = vmatpush.msrb.mxu3 %v916_v52  ;;  %v1469_v57 = vsel %vm650_vm5, 1.0, %v1920_v47  ;;  %v626_v52 = vpop.permute.xlu0 %625 }
 0x117   : > { %v809_v44 = vadd.f32 %v1484_v13, %v697_v10  ;;  %vm652_vm10 = vcmp.eq.s32.totalorder %v626_v52, %v2139_v46 }
 0x118   : > { %950 = vmatpush.msra.mxu1 %v915_v54  ;;  %1530 = vmatpush.msrb.mxu3 %v915_v54 }
 0x119   : > { %v825_v49 = vmul.f32 0.25, %v809_v44 }
 0x11b   : > { %v523_v51 = vpop.permute.xlu1 %522  ;;  %887 = vmatmul.f32.gmra.mxu0 %v825_v49 }
 0x11c   : > { %vm543_vm6 = vcmp.eq.s32.totalorder %v523_v51, %v2139_v46 }
 0x11d   : > { %v732_v53 = vpop.permute.xlu2 %731  ;;  %v1458_v60 = vsel %vm543_vm6, 1.0, %v1920_v47 }
 0x11e   : > { %vm762_vm7 = vcmp.eq.s32.totalorder %v732_v53, %v2139_v46  ;;  %v591_v4 = vadd.f32 %v1458_v60, %v1442_v63 }
 0x11f   : > { %v1485_v62 = vsel %vm762_vm7, 1.0, %v1920_v47 }
 0x120   : > { %v703_v16 = vadd.f32 %v1474_v11, %v591_v4 }
 0x124   : > { %v396_v56 = vpop.permute.xlu1 %395 }
 0x125   : > { %vm426_vm8 = vcmp.eq.s32.totalorder %v396_v56, %v2139_v46 }
 0x126   : > { %v1437_v58 = vsel %vm426_vm8, 1.0, %v1920_v47  ;;  %v399_v59 = vpop.permute.xlu2 %398 }
 0x127   : > { %v586_v61 = vadd.f32 %v1453_v55, %v1437_v58  ;;  %vm427_vm11 = vcmp.eq.s32.totalorder %v399_v59, %v2139_v46 }
 0x128   : > { %v1438_v7 = vsel %vm427_vm11, 1.0, %v1920_v47 }
 0x129   : > { %v698_v3 = vadd.f32 %v1469_v57, %v586_v61  ;;  %v587_v14 = vadd.f32 %v1454_v5, %v1438_v7  ;;  %v1471_v57 = vsel %vm652_vm10, 1.0, %v1920_v47 }
 0x12b   : > { %v810_v8 = vadd.f32 %v1485_v62, %v698_v3  ;;  %v741_v4 = vpop.permute.xlu0 %740 }
 0x12d   : > { %v747_v45 = vpop.permute.xlu1 %746  ;;  %v826_v12 = vmul.f32 0.25, %v810_v8 }
 0x12e   : > { %vm767_vm13 = vcmp.eq.s32.totalorder %v747_v45, %v2139_v46 }
 0x12f   : > { %v1490_v17 = vsel %vm767_vm13, 1.0, %v1920_v47  ;;  %890 = vmatmul.f32.gmra.mxu0 %v826_v12  ;;  %v623_v41 = vpop.permute.xlu2 %622  ;;  %v1031_v12 = vld [vmem:[#allocation7 + $0x78] sm:$0xff] }
 0x130   : > { %vm651_vm15 = vcmp.eq.s32.totalorder %v623_v41, %v2139_v46  ;;  %v815_v18 = vadd.f32 %v1490_v17, %v703_v16  ;;  %1036 = vmatpush.msra.mxu2 %v1031_v12  ;;  %1531 = vmatpush.msra.mxu3 %v1031_v12  ;;  %v1029_v41 = vld [vmem:[#allocation7 + $0x68] sm:$0xff] }
 0x131   : > { %v1470_v19 = vsel %vm651_vm15, 1.0, %v1920_v47  ;;  %vm765_vm15 = vcmp.eq.s32.totalorder %v741_v4, %v2139_v46 }
 0x132   : > { %v699_v21 = vadd.f32 %v1470_v19, %v587_v14  ;;  %v831_v22 = vmul.f32 0.25, %v815_v18  ;;  %v1488_v45 = vsel %vm765_vm15, 1.0, %v1920_v47  ;;  %v1030_v14 = vld [vmem:[#allocation7 + $0x70] sm:$0xff] }
 0x133   : > { %1037 = vmatpush.msra.mxu2 %v1030_v14  ;;  %1532 = vmatpush.msra.mxu3 %v1030_v14 }
 0x134   : > { %905 = vmatmul.f32.gmra.mxu3 %v831_v22  ;;  %v811_v6 = vadd.f32 %v1486_v20, %v699_v21  ;;  %v1027_v20 = vld [vmem:[#allocation7 + $0x58] sm:$0xff]  ;;  %v1026_v21 = vld [vmem:[#allocation7 + $0x50] sm:$0xff]  ;;  %v1025_v22 = vld [vmem:[#allocation7 + $0x48] sm:$0xff] }
 0x135   : > { %1038 = vmatpush.msra.mxu2 %v1029_v41  ;;  %1533 = vmatpush.msra.mxu3 %v1029_v41  ;;  %v1101_v41 = vld [vmem:[%s2362_s14] sm:$0xff] }
 0x136   : > { %v526_v2 = vpop.permute.xlu1 %525  ;;  %v827_v23 = vmul.f32 0.25, %v811_v6  ;;  %v1024_v6 = vld [vmem:[#allocation7 + $0x40] sm:$0xff] }
 0x137   : > { %vm544_vm0 = vcmp.eq.s32.totalorder %v526_v2, %v2139_v46  ;;  %v1023_v2 = vld [vmem:[#allocation7 + $0x38] sm:$0xff] }
 0x138   : > { %893 = vmatmul.f32.gmra.mxu0 %v827_v23  ;;  %v529_v26 = vpop.permute.xlu2 %528  ;;  %v1459_v27 = vsel %vm544_vm0, 1.0, %v1920_v47  ;;  %v1022_v23 = vld [vmem:[#allocation7 + $0x30] sm:$0xff] }
 0x139   : > { %v592_v1 = vadd.f32 %v1459_v27, %v1443_v28  ;;  %vm545_vm4 = vcmp.eq.s32.totalorder %v529_v26, %v2139_v46  ;;  %v1020_v26 = vld [vmem:[#allocation7 + $0x20] sm:$0xff]  ;;  %v1019_v27 = vld [vmem:[#allocation7 + $0x18] sm:$0xff]  ;;  %v1018_v28 = vld [vmem:[#allocation7 + $0x10] sm:$0xff] }
 0x13a   : > { %v1460_v38 = vsel %vm545_vm4, 1.0, %v1920_v47 }
 0x13f   : > { %v638_v24 = vpop.permute.xlu1 %637  ;;  %v867_v25 = vpop.f32.mrf.mxu0 }
 0x140   : > { %951 = vmatmul.f32.vlgmr.msra.gmra.mxu1 %v867_v25  ;;  %vm656_vm2 = vcmp.eq.s32.totalorder %v638_v24, %v2139_v46  ;;  %v1021_v24 = vld [vmem:[#allocation7 + $0x28] sm:$0xff] }
 0x141   : > { %v1475_v29 = vsel %vm656_vm2, 1.0, %v1920_v47  ;;  %v402_v34 = vpop.permute.xlu2 %401 }
 0x142   : > { %v704_v31 = vadd.f32 %v1475_v29, %v592_v1  ;;  %vm428_vm9 = vcmp.eq.s32.totalorder %v402_v34, %v2139_v46  ;;  %v1017_v29 = vld [vmem:[#allocation7 + $0x8] sm:$0xff]  ;;  %v1016_v1 = vld [vmem:[#allocation7] sm:$0xff] }
 0x143   : > { %v1439_v55 = vsel %vm428_vm9, 1.0, %v1920_v47 }
 0x147   : > { %v870_v30 = vpop.f32.mrf.mxu0 }
 0x148   : > { %v750_v0 = vpop.permute.xlu1 %749  ;;  %954 = vmatmul.f32.gmra.mxu1 %v870_v30 }
 0x149   : > { %vm768_vm3 = vcmp.eq.s32.totalorder %v750_v0, %v2139_v46 }
 0x14a   : > { %v1491_v32 = vsel %vm768_vm3, 1.0, %v1920_v47 }
 0x14b   : > { %v816_v33 = vadd.f32 %v1491_v32, %v704_v31  ;;  %v753_v37 = vpop.permute.xlu2 %752  ;;  %v2338_v32 = vld [vmem:[%s2582_s3] ss:$0 sm:$0xff] }
 0x14c   : > { %vm769_vm6 = vcmp.eq.s32.totalorder %v753_v37, %v2139_v46 }
 0x14d   : > { %v832_v15 = vmul.f32 0.25, %v816_v33  ;;  %v1492_v39 = vsel %vm769_vm6, 1.0, %v1920_v47 }
 0x14f   : > { %v873_v35 = vpop.f32.mrf.mxu0  ;;  %908 = vmatmul.f32.gmra.mxu3 %v832_v15 }
 0x150   : > { %957 = vmatmul.f32.gmra.mxu1 %v873_v35 }
 0x151   : > { %v417_v36 = vpop.permute.xlu1 %416 }
 0x152   : > { %vm433_vm5 = vcmp.eq.s32.totalorder %v417_v36, %v2139_v46 }
 0x153   : > { %v1444_v13 = vsel %vm433_vm5, 1.0, %v1920_v47 }
 0x154   : > { %v593_v43 = vadd.f32 %v1460_v38, %v1444_v13  ;;  %v405_v54 = vpop.permute.xlu2 %404 }
 0x155   : > { %vm429_vm12 = vcmp.eq.s32.totalorder %v405_v54, %v2139_v46 }
 0x156   : > { %v1440_v7 = vsel %vm429_vm12, 1.0, %v1920_v47 }
 0x158   : > { %v876_v40 = vpop.f32.mrf.mxu0 }
 0x159   : > { %960 = vmatmul.f32.gmra.mxu1 %v876_v40 }
 0x15a   : > { %v641_v42 = vpop.permute.xlu1 %640 }
 0x15b   : > { %vm657_vm7 = vcmp.eq.s32.totalorder %v641_v42, %v2139_v46 }
 0x15c   : > { %v1476_v10 = vsel %vm657_vm7, 1.0, %v1920_v47 }
 0x15d   : > { %v705_v44 = vadd.f32 %v1476_v10, %v593_v43  ;;  %v629_v3 = vpop.permute.xlu2 %628 }
 0x15e   : > { %vm653_vm13 = vcmp.eq.s32.totalorder %v629_v3, %v2139_v46 }
 0x15f   : > { %v817_v48 = vadd.f32 %v1492_v39, %v705_v44  ;;  %v1472_v9 = vsel %vm653_vm13, 1.0, %v1920_v47 }
 0x160   : > { %v879_v49 = vpop.f32.mrf.mxu0 }
 0x161   : > { %963 = vmatmul.f32.gmra.mxu1 %v879_v49  ;;  %v833_v50 = vmul.f32 0.25, %v817_v48 }
 0x163   : > { %v514_v51 = vpop.permute.xlu1 %513  ;;  %911 = vmatmul.f32.gmra.mxu3 %v833_v50 }
 0x164   : > { %vm540_vm8 = vcmp.eq.s32.totalorder %v514_v51, %v2139_v46 }
 0x165   : > { %v1455_v53 = vsel %vm540_vm8, 1.0, %v1920_v47 }
 0x166   : > { %v588_v56 = vadd.f32 %v1455_v53, %v1439_v55 }
 0x168   : > { %v700_v59 = vadd.f32 %v1471_v57, %v588_v56 }
 0x16c   : > { %v738_v58 = vpop.permute.xlu1 %737 }
 0x16d   : > { %vm764_vm11 = vcmp.eq.s32.totalorder %v738_v58, %v2139_v46  ;;  %v882_v60 = vpop.f32.mrf.mxu0 }
 0x16e   : > { %v1487_v61 = vsel %vm764_vm11, 1.0, %v1920_v47  ;;  %966 = vmatmul.f32.gmra.mxu1 %v882_v60 }
 0x16f   : > { %v812_v62 = vadd.f32 %v1487_v61, %v700_v59 }
 0x171   : > { %v828_v63 = vmul.f32 0.25, %v812_v62 }
 0x173   : > { %896 = vmatmul.f32.gmra.mxu0 %v828_v63 }
 0x175   : > { %v517_v5 = vpop.permute.xlu1 %516 }
 0x176   : > { %vm541_vm14 = vcmp.eq.s32.totalorder %v517_v5, %v2139_v46  ;;  %v1028_v46 = vld [vmem:[#allocation7 + $0x60] sm:$0xff] }
 0x177   : > { %v1456_v8 = vsel %vm541_vm14, 1.0, %v1920_v47  ;;  %1039 = vmatpush.msra.mxu2 %v1028_v46  ;;  %1534 = vmatpush.msra.mxu3 %v1028_v46 }
 0x178   : > { %v589_v11 = vadd.f32 %v1456_v8, %v1440_v7 }
 0x179   : > { %1040 = vmatpush.msra.mxu2 %v1027_v20  ;;  %1535 = vmatpush.msra.mxu3 %v1027_v20  ;;  %v1102_v20 = vld [vmem:[%s2362_s14 + $0x8] sm:$0xff] }
 0x17a   : > { %v701_v16 = vadd.f32 %v1472_v9, %v589_v11 }
 0x17b   : > { %v903_v17 = vpop.f32.mrf.mxu3  ;;  %1041 = vmatpush.msra.mxu2 %v1026_v21  ;;  %1536 = vmatpush.msra.mxu3 %v1026_v21 }
 0x17c   : > { %987 = vmatmul.f32.vlgmr.msrb.gmra.mxu3 %v903_v17  ;;  %v813_v18 = vadd.f32 %v1488_v45, %v701_v16  ;;  %v2355_v16 = vld [vmem:[%s2584_s5] ss:$0 sm:$0xff] }
 0x17d   : > { %1042 = vmatpush.msra.mxu2 %v1025_v22  ;;  %1537 = vmatpush.msra.mxu3 %v1025_v22 }
 0x17e   : > { %v829_v19 = vmul.f32 0.25, %v813_v18 }
 0x17f   : > { %1043 = vmatpush.msra.mxu2 %v1024_v6  ;;  %1538 = vmatpush.msra.mxu3 %v1024_v6  ;;  %v1103_v6 = vld [vmem:[%s2362_s14 + $0x10] sm:$0xff] }
 0x180   : > { %899 = vmatmul.f32.gmra.mxu0 %v829_v19 }
 0x181   : > { %1044 = vmatpush.msra.mxu2 %v1023_v2  ;;  %1539 = vmatpush.msra.mxu3 %v1023_v2 }
 0x183   : > { %1045 = vmatpush.msra.mxu2 %v1022_v23  ;;  %1540 = vmatpush.msra.mxu3 %v1022_v23 }
 0x184   : > { %v885_v47 = vpop.f32.mrf.mxu0 }
 0x185   : > { %969 = vmatmul.f32.gmra.mxu1 %v885_v47  ;;  %1046 = vmatpush.msra.mxu2 %v1021_v24 }
 0x186   : > { %1541 = vmatpush.msra.mxu3 %v1021_v24 }
 0x187   : > { %1047 = vmatpush.msra.mxu2 %v1020_v26 }
 0x188   : > { %1542 = vmatpush.msra.mxu3 %v1020_v26 }
 0x189   : > { %1048 = vmatpush.msra.mxu2 %v1019_v27 }
 0x18a   : > { %1543 = vmatpush.msra.mxu3 %v1019_v27 }
 0x18b   : > { %1049 = vmatpush.msra.mxu2 %v1018_v28 }
 0x18c   : > { %1544 = vmatpush.msra.mxu3 %v1018_v28  ;;  %v1104_v28 = vld [vmem:[%s2362_s14 + $0x18] sm:$0xff] }
 0x18d   : > { %1050 = vmatpush.msra.mxu2 %v1017_v29 }
 0x18e   : > { %1545 = vmatpush.msra.mxu3 %v1017_v29 }
 0x18f   : > { %1051 = vmatpush.msra.mxu2 %v1016_v1 }
 0x190   : > { %1546 = vmatpush.msra.mxu3 %v1016_v1 }
 0x198   : > { %v888_v25 = vpop.f32.mrf.mxu0 }
 0x199   : > { %972 = vmatmul.f32.gmra.mxu1 %v888_v25 }
 0x1ac   : > { %v891_v30 = vpop.f32.mrf.mxu0 }
 0x1ad   : > { %975 = vmatmul.f32.gmra.mxu1 %v891_v30 }
 0x1b5   : > { %v894_v0 = vpop.f32.mrf.mxu0 }
 0x1b6   : > { %978 = vmatmul.f32.gmra.mxu1 %v894_v0 }
 0x1b7   : > { %v906_v31 = vpop.f32.mrf.mxu3 }
 0x1b8   : > { %990 = vmatmul.f32.gmra.mxu3 %v906_v31 }
 0x1bd   : > { %v952_v33 = vpop.f32.mrf.mxu1 }
 0x1be   : > { %v953_v34 = vadd.f32 %v2338_v32, %v952_v33 }
 0x1c0   : > { %v1000_v15 = vmax.f32 %v953_v34, 0.0 }
 0x1c2   : > { %1052 = vmatmul.f32.vlgmr.msra.gmra.mxu2 %v1000_v15 }
 0x1c5   : > { %v955_v35 = vpop.f32.mrf.mxu1 }
 0x1c6   : > { %v956_v36 = vadd.f32 %v2338_v32, %v955_v35 }
 0x1c8   : > { %v1001_v37 = vmax.f32 %v956_v36, 0.0 }
 0x1ca   : > { %1055 = vmatmul.f32.gmra.mxu2 %v1001_v37  ;;  %v1106_v37 = vld [vmem:[%s2362_s14 + $0x28] sm:$0xff] }
 0x1cd   : > { %v958_v38 = vpop.f32.mrf.mxu1 }
 0x1ce   : > { %v959_v13 = vadd.f32 %v2338_v32, %v958_v38 }
 0x1d0   : > { %v1002_v40 = vmax.f32 %v959_v13, 0.0 }
 0x1d2   : > { %v909_v42 = vpop.f32.mrf.mxu3  ;;  %1058 = vmatmul.f32.gmra.mxu2 %v1002_v40 }
 0x1d3   : > { %993 = vmatmul.f32.gmra.mxu3 %v909_v42 }
 0x1d6   : > { %v961_v43 = vpop.f32.mrf.mxu1 }
 0x1d7   : > { %v962_v10 = vadd.f32 %v2338_v32, %v961_v43 }
 0x1d9   : > { %v1003_v39 = vmax.f32 %v962_v10, 0.0 }
 0x1db   : > { %1061 = vmatmul.f32.gmra.mxu2 %v1003_v39  ;;  %v1113_v39 = vld [vmem:[%s2362_s14 + $0x60] sm:$0xff] }
 0x1de   : > { %v964_v44 = vpop.f32.mrf.mxu1 }
 0x1df   : > { %v965_v48 = vadd.f32 %v2338_v32, %v964_v44 }
 0x1e1   : > { %v1004_v49 = vmax.f32 %v965_v48, 0.0 }
 0x1e3   : > { %1064 = vmatmul.f32.gmra.mxu2 %v1004_v49 }
 0x1e6   : > { %v912_v50 = vpop.f32.mrf.mxu3 }
 0x1e7   : > { %996 = vmatmul.f32.gmra.mxu3 %v912_v50  ;;  %v1105_v50 = vld [vmem:[%s2362_s14 + $0x20] sm:$0xff] }
 0x1eb   : > { %v967_v51 = vpop.f32.mrf.mxu1 }
 0x1ec   : > { %v968_v52 = vadd.f32 %v2338_v32, %v967_v51 }
 0x1ee   : > { %v1005_v53 = vmax.f32 %v968_v52, 0.0 }
 0x1f0   : > { %v897_v54 = vpop.f32.mrf.mxu0  ;;  %1067 = vmatmul.f32.gmra.mxu2 %v1005_v53  ;;  %v1107_v53 = vld [vmem:[%s2362_s14 + $0x30] sm:$0xff] }
 0x1f1   : > { %981 = vmatmul.f32.gmra.mxu1 %v897_v54 }
 0x1fd   : > { %v900_v55 = vpop.f32.mrf.mxu0 }
 0x1fe   : > { %984 = vmatmul.f32.gmra.mxu1 %v900_v55 }
 0x1ff   : > { %v988_v56 = vpop.f32.mrf.mxu3 }
 0x200   : > { %v989_v57 = vadd.f32 %v2338_v32, %v988_v56  ;;  %v1108_v56 = vld [vmem:[%s2362_s14 + $0x38] sm:$0xff] }
 0x202   : > { %v1012_v58 = vmax.f32 %v989_v57, 0.0  ;;  %v970_v59 = vpop.f32.mrf.mxu1 }
 0x203   : > { %v971_v60 = vadd.f32 %v2338_v32, %v970_v59 }
 0x204   : > { %1088 = vmatmul.f32.vlgmr.msra.gmra.mxu3 %v1012_v58 }
 0x205   : > { %v1006_v61 = vmax.f32 %v971_v60, 0.0  ;;  %v1109_v60 = vld [vmem:[%s2362_s14 + $0x40] sm:$0xff] }
 0x207   : > { %1070 = vmatmul.f32.gmra.mxu2 %v1006_v61 }
 0x216   : > { %v973_v62 = vpop.f32.mrf.mxu1 }
 0x217   : > { %v974_v63 = vadd.f32 %v2338_v32, %v973_v62 }
 0x219   : > { %v1007_v3 = vmax.f32 %v974_v63, 0.0 }
 0x21b   : > { %1073 = vmatmul.f32.gmra.mxu2 %v1007_v3  ;;  %v1110_v3 = vld [vmem:[%s2362_s14 + $0x48] sm:$0xff] }
 0x22a   : > { %v976_v4 = vpop.f32.mrf.mxu1 }
 0x22b   : > { %v977_v5 = vadd.f32 %v2338_v32, %v976_v4 }
 0x22d   : > { %v1008_v7 = vmax.f32 %v977_v5, 0.0 }
 0x22f   : > { %1076 = vmatmul.f32.gmra.mxu2 %v1008_v7 }
 0x233   : > { %v979_v8 = vpop.f32.mrf.mxu1 }
 0x234   : > { %v980_v9 = vadd.f32 %v2338_v32, %v979_v8 }
 0x236   : > { %v1009_v11 = vmax.f32 %v980_v9, 0.0 }
 0x238   : > { %1079 = vmatmul.f32.gmra.mxu2 %v1009_v11 }
 0x23b   : > { %v991_v45 = vpop.f32.mrf.mxu3 }
 0x23c   : > { %v992_v12 = vadd.f32 %v2338_v32, %v991_v45 }
 0x23e   : > { %v1013_v14 = vmax.f32 %v992_v12, 0.0 }
 0x240   : > { %1091 = vmatmul.f32.gmra.mxu3 %v1013_v14 }
 0x245   : > { %v1053_v17 = vpop.f32.mrf.mxu2 }
 0x246   : > { %v1054_v18 = vadd.f32 %v2355_v16, %v1053_v17  ;;  %v1116_v17 = vld [vmem:[%s2362_s14 + $0x78] sm:$0xff] }
 0x248   : > { %v2366_v46 = vadd.f32 %v1101_v41, %v1054_v18 }
 0x24a   : > { %1133 = vmax.xlane.f32.xlu1 %v2366_v46 }
 0x24d   : > { %v1056_v19 = vpop.f32.mrf.mxu2 }
 0x24e   : > { %v1057_v47 = vadd.f32 %v2355_v16, %v1056_v19 }
 0x250   : > { %v2371_v21 = vadd.f32 %v1102_v20, %v1057_v47 }
 0x252   : > { %1135 = vmax.xlane.f32.xlu2 %v2371_v21 }
 0x255   : > { %v1059_v22 = vpop.f32.mrf.mxu2 }
 0x256   : > { %v1060_v2 = vadd.f32 %v2355_v16, %v1059_v22  ;;  %v994_v23 = vpop.f32.mrf.mxu3  ;;  %v1111_v22 = vld [vmem:[%s2362_s14 + $0x50] sm:$0xff] }
 0x257   : > { %v995_v24 = vadd.f32 %v2338_v32, %v994_v23 }
 0x258   : > { %v2377_v25 = vadd.f32 %v1103_v6, %v1060_v2 }
 0x259   : > { %v1014_v26 = vmax.f32 %v995_v24, 0.0 }
 0x25a   : > { %1137 = vmax.xlane.f32.xlu0 %v2377_v25 }
 0x25b   : > { %1094 = vmatmul.f32.gmra.mxu3 %v1014_v26 }
 0x25e   : > { %v1062_v27 = vpop.f32.mrf.mxu2 }
 0x25f   : > { %v1063_v29 = vadd.f32 %v2355_v16, %v1062_v27 }
 0x261   : > { %v2382_v1 = vadd.f32 %v1104_v28, %v1063_v29  ;;  %v1114_v29 = vld [vmem:[%s2362_s14 + $0x68] sm:$0xff] }
 0x263   : > { %1139 = vmax.xlane.f32.xlu2 %v2382_v1 }
 0x266   : > { %v1065_v0 = vpop.f32.mrf.mxu2 }
 0x267   : > { %v1066_v49 = vadd.f32 %v2355_v16, %v1065_v0 }
 0x269   : > { %v2397_v51 = vadd.f32 %v1105_v50, %v1066_v49 }
 0x26a   : > { %v997_v30 = vpop.f32.mrf.mxu3 }
 0x26b   : > { %v998_v31 = vadd.f32 %v2338_v32, %v997_v30 }
 0x26d   : > { %v1015_v33 = vmax.f32 %v998_v31, 0.0 }
 0x26e   : > { %v982_v34 = vpop.f32.mrf.mxu1 }
 0x26f   : > { %v983_v15 = vadd.f32 %v2338_v32, %v982_v34  ;;  %1097 = vmatmul.f32.gmra.mxu3 %v1015_v33  ;;  %v1112_v34 = vld [vmem:[%s2362_s14 + $0x58] sm:$0xff] }
 0x271   : > { %v1010_v35 = vmax.f32 %v983_v15, 0.0 }
 0x273   : > { %v1068_v36 = vpop.f32.mrf.mxu2  ;;  %1082 = vmatmul.f32.gmra.mxu2 %v1010_v35 }
 0x274   : > { %v1069_v38 = vadd.f32 %v2355_v16, %v1068_v36 }
 0x276   : > { %v1122_v13 = vadd.f32 %v1106_v37, %v1069_v38 }
 0x278   : > { %1143 = vmax.xlane.f32.xlu2 %v1122_v13 }
 0x27b   : > { %v985_v40 = vpop.f32.mrf.mxu1 }
 0x27c   : > { %v986_v42 = vadd.f32 %v2338_v32, %v985_v40 }
 0x27e   : > { %v1011_v43 = vmax.f32 %v986_v42, 0.0 }
 0x280   : > { %1085 = vmatmul.f32.gmra.mxu2 %v1011_v43  ;;  %v1115_v43 = vld [vmem:[%s2362_s14 + $0x70] sm:$0xff] }
 0x287   : > { %v1089_v10 = vpop.f32.mrf.mxu3 }
 0x288   : > { %v1090_v44 = vadd.f32 %v2355_v16, %v1089_v10 }
 0x28a   : > { %v2392_v48 = vadd.f32 %v1113_v39, %v1090_v44  ;;  %v1071_v52 = vpop.f32.mrf.mxu2 }
 0x28b   : > { %v1072_v32 = vadd.f32 %v2355_v16, %v1071_v52 }
 0x28c   : > { %1157 = vmax.xlane.f32.xlu1 %v2392_v48 }
 0x28d   : > { %v2402_v54 = vadd.f32 %v1107_v53, %v1072_v32 }
 0x294   : > { %1141 = vmax.xlane.f32.xlu1 %v2397_v51 }
 0x29c   : > { %1145 = vmax.xlane.f32.xlu1 %v2402_v54 }
 0x29e   : > { %v1074_v55 = vpop.f32.mrf.mxu2 }
 0x29f   : > { %v1075_v57 = vadd.f32 %v2355_v16, %v1074_v55 }
 0x2a1   : > { %v2407_v58 = vadd.f32 %v1108_v56, %v1075_v57 }
 0x2a3   : > { %1147 = vmax.xlane.f32.xlu2 %v2407_v58 }
 0x2b2   : > { %v1077_v59 = vpop.f32.mrf.mxu2 }
 0x2b3   : > { %v1078_v61 = vadd.f32 %v2355_v16, %v1077_v59 }
 0x2b5   : > { %v2412_v62 = vadd.f32 %v1109_v60, %v1078_v61 }
 0x2b7   : > { %1149 = vmax.xlane.f32.xlu0 %v2412_v62 }
 0x2bb   : > { %v1080_v63 = vpop.f32.mrf.mxu2 }
 0x2bc   : > { %v1081_v4 = vadd.f32 %v2355_v16, %v1080_v63 }
 0x2bd   : > { %v1134_v6 = vpop.xlane.xlu1 %1133 }
 0x2be   : > { %v2417_v5 = vadd.f32 %v1110_v3, %v1081_v4 }
 0x2c0   : > { %1151 = vmax.xlane.f32.xlu1 %v2417_v5 }
 0x2c3   : > { %v1092_v7 = vpop.f32.mrf.mxu3 }
 0x2c4   : > { %v1093_v27 = vadd.f32 %v2355_v16, %v1092_v7 }
 0x2c5   : > { %v1136_v8 = vpop.xlane.xlu2 %1135 }
 0x2c6   : > { %v2437_v31 = vadd.f32 %v1114_v29, %v1093_v27 }
 0x2cd   : > { %v1138_v11 = vpop.xlane.xlu0 %1137 }
 0x2ce   : > { %v1167_v12 = vsub.f32 %v2377_v25, %v1138_v11  ;;  %v1165_v25 = vsub.f32 %v2366_v46, %v1134_v6 }
 0x2d0   : > { %v1185_v18 = vmul.f32 1.442695, %v1167_v12  ;;  %v1181_v0 = vmul.f32 1.442695, %v1165_v25 }
 0x2d2   : > { %1685 = vpow2.f32 %v1185_v18 }
 0x2d6   : > { %v1140_v45 = vpop.xlane.xlu2 %1139 }
 0x2d7   : > { %v1168_v10 = vsub.f32 %v2382_v1, %v1140_v45 }
 0x2d8   : > { %v2433_v28 = vpop.eup %1685 }
 0x2de   : > { %v1095_v9 = vpop.f32.mrf.mxu3 }
 0x2df   : > { %v1096_v42 = vadd.f32 %v2355_v16, %v1095_v9 }
 0x2e1   : > { %v2456_v44 = vadd.f32 %v1115_v43, %v1096_v42 }
 0x2eb   : > { %v1144_v19 = vpop.xlane.xlu2 %1143 }
 0x2ec   : > { %v1170_v23 = vsub.f32 %v1122_v13, %v1144_v19  ;;  %v1166_v13 = vsub.f32 %v2371_v21, %v1136_v8 }
 0x2ee   : > { %v1191_v26 = vmul.f32 1.442695, %v1170_v23  ;;  %v1183_v39 = vmul.f32 1.442695, %v1166_v13 }
 0x2f0   : > { %1687 = vpow2.f32 %v1191_v26 }
 0x2f1   : > { %1689 = vpow2.f32 %v1181_v0 }
 0x2f2   : > { %v1098_v14 = vpop.f32.mrf.mxu3 }
 0x2f3   : > { %v1099_v41 = vadd.f32 %v2355_v16, %v1098_v14 }
 0x2f5   : > { %v2423_v20 = vadd.f32 %v1116_v17, %v1099_v41 }
 0x2f6   : > { %v1083_v47 = vpop.f32.mrf.mxu2  ;;  %v2443_v35 = vpop.eup %1687 }
 0x2f7   : > { %v1084_v2 = vadd.f32 %v2355_v16, %v1083_v47  ;;  %1163 = vmax.xlane.f32.xlu1 %v2423_v20  ;;  %v2450_v40 = vpop.eup %1689 }
 0x2f9   : > { %v2428_v24 = vadd.f32 %v1111_v22, %v1084_v2 }
 0x2fb   : > { %1153 = vmax.xlane.f32.xlu2 %v2428_v24 }
 0x2ff   : > { %v1158_v30 = vpop.xlane.xlu1 %1157  ;;  %1217 = vadd.xlane.f32.xlu1 %v2433_v28 }
 0x300   : > { %v1177_v46 = vsub.f32 %v2392_v48, %v1158_v30  ;;  %v1187_v48 = vmul.f32 1.442695, %v1168_v10 }
 0x302   : > { %v1205_v38 = vmul.f32 1.442695, %v1177_v46 }
 0x303   : > { %1159 = vmax.xlane.f32.xlu2 %v2437_v31  ;;  %v1086_v33 = vpop.f32.mrf.mxu2 }
 0x304   : > { %v1087_v15 = vadd.f32 %v2355_v16, %v1086_v33  ;;  %1691 = vpow2.f32 %v1205_v38 }
 0x305   : > { %1693 = vpow2.f32 %v1183_v39 }
 0x306   : > { %v2445_v36 = vadd.f32 %v1112_v34, %v1087_v15  ;;  %1695 = vpow2.f32 %v1187_v48 }
 0x307   : > { %v1142_v37 = vpop.xlane.xlu1 %1141  ;;  %1223 = vadd.xlane.f32.xlu1 %v2443_v35 }
 0x308   : > { %1155 = vmax.xlane.f32.xlu0 %v2445_v36  ;;  %v1169_v49 = vsub.f32 %v2397_v51, %v1142_v37 }
 0x30a   : > { %v2460_v50 = vpop.eup %1691  ;;  %v1189_v52 = vmul.f32 1.442695, %v1169_v49 }
 0x30b   : > { %1213 = vadd.xlane.f32.xlu2 %v2450_v40  ;;  %v2464_v32 = vpop.eup %1693 }
 0x30c   : > { %1697 = vpow2.f32 %v1189_v52  ;;  %v2468_v56 = vpop.eup %1695 }
 0x30f   : > { %v1146_v21 = vpop.xlane.xlu1 %1145 }
 0x310   : > { %1161 = vmax.xlane.f32.xlu0 %v2456_v44  ;;  %v1171_v16 = vsub.f32 %v2402_v54, %v1146_v21 }
 0x312   : > { %v1193_v53 = vmul.f32 1.442695, %v1171_v16  ;;  %v2471_v57 = vpop.eup %1697 }
 0x313   : > { %1237 = vadd.xlane.f32.xlu2 %v2460_v50 }
 0x314   : > { %1699 = vpow2.f32 %v1193_v53 }
 0x316   : > { %v1148_v1 = vpop.xlane.xlu2 %1147 }
 0x317   : > { %v1172_v55 = vsub.f32 %v2407_v58, %v1148_v1 }
 0x318   : > { %1215 = vadd.xlane.f32.xlu0 %v2464_v32 }
 0x319   : > { %v1195_v51 = vmul.f32 1.442695, %v1172_v55 }
 0x31a   : > { %v2474_v54 = vpop.eup %1699 }
 0x31b   : > { %1219 = vadd.xlane.f32.xlu2 %v2468_v56  ;;  %1701 = vpow2.f32 %v1195_v51 }
 0x320   : > { %1221 = vadd.xlane.f32.xlu0 %v2471_v57 }
 0x321   : > { %v2477_v59 = vpop.eup %1701 }
 0x323   : > { %1225 = vadd.xlane.f32.xlu2 %v2474_v54 }
 0x328   : > { %1227 = vadd.xlane.f32.xlu0 %v2477_v59 }
 0x32a   : > { %v1150_v58 = vpop.xlane.xlu0 %1149 }
 0x32b   : > { %v1173_v60 = vsub.f32 %v2412_v62, %v1150_v58 }
 0x32d   : > { %v1197_v61 = vmul.f32 1.442695, %v1173_v60 }
 0x32f   : > { %1703 = vpow2.f32 %v1197_v61 }
 0x333   : > { %v1152_v63 = vpop.xlane.xlu1 %1151 }
 0x334   : > { %v1174_v3 = vsub.f32 %v2417_v5, %v1152_v63 }
 0x335   : > { %v2482_v4 = vpop.eup %1703 }
 0x336   : > { %v1199_v7 = vmul.f32 1.442695, %v1174_v3  ;;  %1229 = vadd.xlane.f32.xlu1 %v2482_v4 }
 0x338   : > { %1705 = vpow2.f32 %v1199_v7 }
 0x33e   : > { %v2485_v8 = vpop.eup %1705 }
 0x33f   : > { %1231 = vadd.xlane.f32.xlu2 %v2485_v8 }
 0x36a   : > { %v1164_v9 = vpop.xlane.xlu1 %1163 }
 0x36b   : > { %v1180_v62 = vsub.f32 %v2423_v20, %v1164_v9 }
 0x36d   : > { %v1211_v11 = vmul.f32 1.442695, %v1180_v62 }
 0x36e   : > { %v1154_v45 = vpop.xlane.xlu2 %1153 }
 0x36f   : > { %1707 = vpow2.f32 %v1211_v11  ;;  %v1175_v5 = vsub.f32 %v2428_v24, %v1154_v45 }
 0x371   : > { %v1201_v12 = vmul.f32 1.442695, %v1175_v5 }
 0x372   : > { %v1218_v14 = vpop.xlane.xlu1 %1217 }
 0x373   : > { %1709 = vpow2.f32 %v1201_v12 }
 0x374   : > { %1711 = vrcp.f32 %v1218_v14 }
 0x375   : > { %v2491_v17 = vpop.eup %1707 }
 0x376   : > { %1243 = vadd.xlane.f32.xlu2 %v2491_v17  ;;  %v1160_v41 = vpop.xlane.xlu2 %1159 }
 0x377   : > { %v1178_v18 = vsub.f32 %v2437_v31, %v1160_v41 }
 0x379   : > { %v2497_v19 = vpop.eup %1709  ;;  %v1207_v20 = vmul.f32 1.442695, %v1178_v18 }
 0x37a   : > { %v1712_v47 = vpop.eup %1711  ;;  %1233 = vadd.xlane.f32.xlu0 %v2497_v19  ;;  %v1224_v22 = vpop.xlane.xlu1 %1223 }
 0x37b   : > { %v1263_v6 = vmul.f32 %v1712_v47, %v2433_v28  ;;  %1713 = vpow2.f32 %v1207_v20  ;;  %v1156_v2 = vpop.xlane.xlu0 %1155 }
 0x37c   : > { %1715 = vrcp.f32 %v1224_v22  ;;  %v1176_v23 = vsub.f32 %v2445_v36, %v1156_v2 }
 0x37d   : > { %1279 = vst [vmem:[%s2502_s18 + $0x10] sm:$0xff] %v1263_v6 }
 0x37e   : > { %v1203_v24 = vmul.f32 1.442695, %v1176_v23  ;;  %v1214_v25 = vpop.xlane.xlu2 %1213 }
 0x37f   : > { %1717 = vrcp.f32 %v1214_v25 }
 0x380   : > { %1719 = vpow2.f32 %v1203_v24 }
 0x381   : > { %v2505_v26 = vpop.eup %1713 }
 0x382   : > { %v1716_v27 = vpop.eup %1715  ;;  %1239 = vadd.xlane.f32.xlu0 %v2505_v26 }
 0x383   : > { %v1266_v28 = vmul.f32 %v1716_v27, %v2443_v35  ;;  %v1162_v29 = vpop.xlane.xlu0 %1161 }
 0x384   : > { %v1179_v30 = vsub.f32 %v2456_v44, %v1162_v29 }
 0x385   : > { %v1718_v0 = vpop.eup %1717  ;;  %1282 = vst [vmem:[%s2502_s18 + $0x28] sm:$0xff] %v1266_v28 }
 0x386   : > { %v2511_v31 = vpop.eup %1719  ;;  %v1261_v33 = vmul.f32 %v1718_v0, %v2450_v40  ;;  %v1209_v34 = vmul.f32 1.442695, %v1179_v30  ;;  %v1238_v46 = vpop.xlane.xlu2 %1237 }
 0x387   : > { %1721 = vrcp.f32 %v1238_v46  ;;  %1235 = vadd.xlane.f32.xlu1 %v2511_v31 }
 0x388   : > { %1277 = vst [vmem:[%s2502_s18] sm:$0xff] %v1261_v33  ;;  %1723 = vpow2.f32 %v1209_v34 }
 0x38b   : > { %v1216_v15 = vpop.xlane.xlu0 %1215 }
 0x38c   : > { %1725 = vrcp.f32 %v1216_v15 }
 0x38d   : > { %v1722_v35 = vpop.eup %1721 }
 0x38e   : > { %v2516_v36 = vpop.eup %1723  ;;  %v1273_v37 = vmul.f32 %v1722_v35, %v2460_v50  ;;  %v1220_v38 = vpop.xlane.xlu2 %1219 }
 0x38f   : > { %1727 = vrcp.f32 %v1220_v38  ;;  %1241 = vadd.xlane.f32.xlu1 %v2516_v36 }
 0x390   : > { %1289 = vst [vmem:[%s2502_s18 + $0x60] sm:$0xff] %v1273_v37 }
 0x392   : > { %v1726_v13 = vpop.eup %1725 }
 0x393   : > { %v1262_v40 = vmul.f32 %v1726_v13, %v2464_v32  ;;  %v1222_v42 = vpop.xlane.xlu0 %1221 }
 0x394   : > { %1729 = vrcp.f32 %v1222_v42 }
 0x395   : > { %v1728_v43 = vpop.eup %1727  ;;  %1278 = vst [vmem:[%s2502_s18 + $0x8] sm:$0xff] %v1262_v40 }
 0x396   : > { %v1264_v10 = vmul.f32 %v1728_v43, %v2468_v56  ;;  %v1226_v39 = vpop.xlane.xlu2 %1225 }
 0x397   : > { %1731 = vrcp.f32 %v1226_v39 }
 0x398   : > { %1280 = vst [vmem:[%s2502_s18 + $0x18] sm:$0xff] %v1264_v10 }
 0x39a   : > { %v1730_v44 = vpop.eup %1729 }
 0x39b   : > { %v1265_v48 = vmul.f32 %v1730_v44, %v2471_v57  ;;  %v1228_v49 = vpop.xlane.xlu0 %1227 }
 0x39c   : > { %1733 = vrcp.f32 %v1228_v49 }
 0x39d   : > { %v1732_v21 = vpop.eup %1731  ;;  %1281 = vst [vmem:[%s2502_s18 + $0x20] sm:$0xff] %v1265_v48 }
 0x39e   : > { %v1267_v50 = vmul.f32 %v1732_v21, %v2474_v54 }
 0x3a0   : > { %1283 = vst [vmem:[%s2502_s18 + $0x30] sm:$0xff] %v1267_v50 }
 0x3a2   : > { %v1734_v16 = vpop.eup %1733 }
 0x3a3   : > { %v1268_v52 = vmul.f32 %v1734_v16, %v2477_v59 }
 0x3a5   : > { %1284 = vst [vmem:[%s2502_s18 + $0x38] sm:$0xff] %v1268_v52 }
 0x3a9   : > { %v1230_v1 = vpop.xlane.xlu1 %1229 }
 0x3aa   : > { %1735 = vrcp.f32 %v1230_v1 }
 0x3b0   : > { %v1736_v32 = vpop.eup %1735 }
 0x3b1   : > { %v1269_v53 = vmul.f32 %v1736_v32, %v2482_v4 }
 0x3b2   : > { %v1232_v55 = vpop.xlane.xlu2 %1231 }
 0x3b3   : > { %1285 = vst [vmem:[%s2502_s18 + $0x40] sm:$0xff] %v1269_v53  ;;  %1737 = vrcp.f32 %v1232_v55 }
 0x3b9   : > { %v1738_v56 = vpop.eup %1737 }
 0x3ba   : > { %v1270_v51 = vmul.f32 %v1738_v56, %v2485_v8 }
 0x3bc   : > { %1286 = vst [vmem:[%s2502_s18 + $0x48] sm:$0xff] %v1270_v51 }
 0x3e9   : > { %v1244_v57 = vpop.xlane.xlu2 %1243 }
 0x3ea   : > { %1739 = vrcp.f32 %v1244_v57 }
 0x3ed   : > { %v1234_v54 = vpop.xlane.xlu0 %1233 }
 0x3ee   : > { %1741 = vrcp.f32 %v1234_v54 }
 0x3f0   : > { %v1740_v59 = vpop.eup %1739 }
 0x3f1   : > { %v1276_v58 = vmul.f32 %v1740_v59, %v2491_v17 }
 0x3f3   : > { %1292 = vst [vmem:[%s2502_s18 + $0x78] sm:$0xff] %v1276_v58 }
 0x3f4   : > { %v1742_v60 = vpop.eup %1741 }
 0x3f5   : > { %v1271_v61 = vmul.f32 %v1742_v60, %v2497_v19  ;;  %v1240_v63 = vpop.xlane.xlu0 %1239 }
 0x3f6   : > { %1743 = vrcp.f32 %v1240_v63 }
 0x3f7   : > { %1287 = vst [vmem:[%s2502_s18 + $0x50] sm:$0xff] %v1271_v61 }
 0x3fa   : > { %v1236_v3 = vpop.xlane.xlu1 %1235 }
 0x3fb   : > { %1745 = vrcp.f32 %v1236_v3 }
 0x3fc   : > { %v1744_v4 = vpop.eup %1743 }
 0x3fd   : > { %v1274_v7 = vmul.f32 %v1744_v4, %v2505_v26 }
 0x3ff   : > { %1290 = vst [vmem:[%s2502_s18 + $0x68] sm:$0xff] %v1274_v7 }
 0x401   : > { %v1746_v8 = vpop.eup %1745 }
 0x402   : > { %v1272_v9 = vmul.f32 %v1746_v8, %v2511_v31  ;;  %v1242_v62 = vpop.xlane.xlu1 %1241 }
 0x403   : > { %1747 = vrcp.f32 %v1242_v62 }
 0x404   : > { %1288 = vst [vmem:[%s2502_s18 + $0x58] sm:$0xff] %v1272_v9 }
 0x409   : > { %v1748_v11 = vpop.eup %1747 }
 0x40a   : > { %v1275_v45 = vmul.f32 %v1748_v11, %v2516_v36 }
 0x40c   : > { %1291 = vst [vmem:[%s2502_s18 + $0x70] sm:$0xff] %v1275_v45 }
 0x40d   : > { %1866 = shalt.err (!%p1863_p8)
}
 0x40e   : > { %s1921_s15 = smov 128   ;;  %s1922_s18 = smov 8  }
 0x40f   : > { %1559 = dma.vmem_to_hbm [thread:$0]  (%p2001_p5), %s1307_s20, 2048, %s1309_s21, %s1294_s28, %s1921_s15, %s1921_s15, %s1922_s18  }
 0x410 PF: > { %p1581_p9 = scmp.ge.s32.totalorder %s1909_s27, 2  ;;  %s1323_s16 = sand.u32 1, %s1897_s24  }
 0x411   : > { %s1324_s1 = scalar_lea.sflag [#allocation4], %s1323_s16 }
 0x412   : > { %p1572_p10 = pnand %p1581_p9, %p2005_p6 }
 0x414   : > { %p1573_p11 = pneg %p1572_p10 }
 0x416   : > { %1892 = dma.done.wait (%p1573_p11), %s1324_s1, 2048  }
 0x417   : > { %1894 = vsyncadd (%p1573_p11), %s1324_s1, 4294965248  ;;  %p19_p12 = scmp.ge.s32.totalorder %s1988_s30, 4   ;;  %s2593_s24 = smov %s1901_s25 }
 0x418   : > { %s2594_s25 = smov %s1905_s26  ;;  %s2595_s26 = smov %s1999_s10 }
 0x419   : > { %s2596_s27 = smov %s1988_s30  ;;  %21 = sbr.rel (!%p19_p12) target bundleno = 7 (0x7), region = 99 }
 0x41e   :  { %1330 = vsyncpa [#allocation3], 1 }
 0x41f   :  { %1332 = vsyncpa [#allocation3 + $0x1], 1 }
 0x420   :  { %1333 = vsyncpa [#allocation6], 1 }
 0x421   :  { %1334 = vsyncpa [#allocation4], 1 }
 0x422   :  { %1336 = vsyncpa [#allocation4 + $0x1], 1 }

</bundles_post_ra>
